<compile_context>
chip_gen: v6e
topology: v6e:2x2x1
jax: 0.10.0
libtpu: 0.0.40
codegen_flags: <defaults>
</compile_context>

<pallas_src>
import functools

import jax
import jax.numpy as jnp
from jax.experimental import pallas as pl
from jax.experimental.pallas import tpu as pltpu


def _lstm_seq_kernel(layers, hidden_size,
                     x_ref, emb_w_ref, emb_b_ref, w_ref, b_ref,
                     h0_ref, c0_ref, fc_w_ref, fc_b_ref,
                     out_ref, h_ref, c_ref):
    """One grid step == one timestep.

    h_ref / c_ref (outputs with a constant block index) double as the
    VMEM-resident recurrent state across grid steps; they are initialized from
    h0/c0 at t == 0 and written back to HBM only once, after the last step.
    """
    H = hidden_size
    t = pl.program_id(0)

    @pl.when(t == 0)
    def _():
        h_ref[...] = h0_ref[...]
        c_ref[...] = c0_ref[...]

    # embedding = Linear(input_size, hidden_size)
    x = x_ref[0]                                               # (B, input_size) f32
    emb = jnp.dot(x.astype(jnp.bfloat16), emb_w_ref[...],
                  preferred_element_type=jnp.float32) + emb_b_ref[...]

    # stacked LSTMCells (PyTorch gate order: i, f, g, o), fused ih/hh matmul
    for l in range(layers):
        h_prev = h_ref[l]                                      # (B, H) f32
        c_prev = c_ref[l]
        xh = jnp.concatenate([emb, h_prev], axis=1).astype(jnp.bfloat16)
        gates = jnp.dot(xh, w_ref[l],
                        preferred_element_type=jnp.float32) + b_ref[l]
        i_g = jax.nn.sigmoid(gates[:, 0 * H:1 * H])
        f_g = jax.nn.sigmoid(gates[:, 1 * H:2 * H])
        g_g = jnp.tanh(gates[:, 2 * H:3 * H])
        o_g = jax.nn.sigmoid(gates[:, 3 * H:4 * H])
        c_new = f_g * c_prev + i_g * g_g
        h_new = o_g * jnp.tanh(c_new)
        h_ref[l] = h_new
        c_ref[l] = c_new
        emb = h_new

    # fc = Linear(hidden_size, padded_output) followed by Tanh
    out = jnp.dot(emb.astype(jnp.bfloat16), fc_w_ref[...],
                  preferred_element_type=jnp.float32)
    out_ref[0] = jnp.tanh(out + fc_b_ref[...])


class PallasLSTM:
    """JAX/Pallas port of the PyTorch LSTM module (stateful, step or sequence)."""

    def __init__(self, input_size, hidden_size, output_size, batch_size,
                 layers=1, key=jax.random.PRNGKey(0)):
        self.input_size = input_size
        self.hidden_size = hidden_size
        self.output_size = output_size
        self.batch_size = batch_size
        self.layers = layers
        # Pad the fc output to a full 128-lane width (unmasked stores); the
        # padded columns are sliced off outside the kernel.
        self.padded_output = max(128, ((output_size + 127) // 128) * 128)

        ks = jax.random.split(key, 6)
        scale = 0.05
        H = hidden_size
        # nn.Linear(input_size, hidden_size)  (stored transposed: (in, out))
        self.emb_w = (scale * jax.random.normal(ks[0], (input_size, H), jnp.float32)
                      ).astype(jnp.bfloat16)
        self.emb_b = scale * jax.random.normal(ks[1], (1, H), jnp.float32)
        # nn.LSTMCell(H, H) per layer: fused [W_ih; W_hh] -> (L, 2H, 4H), bf16
        w_ih = scale * jax.random.normal(ks[2], (layers, H, 4 * H), jnp.float32)
        w_hh = scale * jax.random.normal(ks[3], (layers, H, 4 * H), jnp.float32)
        self.w = jnp.concatenate([w_ih, w_hh], axis=1).astype(jnp.bfloat16)
        # b_ih + b_hh pre-combined (zeros here, kept f32)
        self.b = jnp.zeros((layers, 1, 4 * H), jnp.float32)
        # nn.Linear(H, output_size), zero-padded to padded_output columns
        fc_w = scale * jax.random.normal(ks[4], (H, output_size), jnp.float32)
        fc_b = scale * jax.random.normal(ks[5], (1, output_size), jnp.float32)
        pad = self.padded_output - output_size
        self.fc_w = jnp.pad(fc_w, ((0, 0), (0, pad))).astype(jnp.bfloat16)
        self.fc_b = jnp.pad(fc_b, ((0, 0), (0, pad)))

        self.h, self.c = self.init_hidden()
        self._calls = {}

    def init_hidden(self):
        h = jnp.zeros((self.layers, self.batch_size, self.hidden_size), jnp.float32)
        c = jnp.zeros((self.layers, self.batch_size, self.hidden_size), jnp.float32)
        return h, c

    def _get_call(self, T):
        if T in self._calls:
            return self._calls[T]
        B, In = self.batch_size, self.input_size
        H, L, P = self.hidden_size, self.layers, self.padded_output
        kernel = functools.partial(_lstm_seq_kernel, L, H)
        grid_spec = pltpu.PrefetchScalarGridSpec(
            num_scalar_prefetch=0,
            grid=(T,),
            in_specs=[
                pl.BlockSpec((1, B, In), lambda t: (t, 0, 0)),        # x[t]
                pl.BlockSpec((In, H), lambda t: (0, 0)),              # emb_w (bf16)
                pl.BlockSpec((1, H), lambda t: (0, 0)),               # emb_b
                pl.BlockSpec((L, 2 * H, 4 * H), lambda t: (0, 0, 0)), # fused W (bf16)
                pl.BlockSpec((L, 1, 4 * H), lambda t: (0, 0, 0)),     # fused bias
                pl.BlockSpec((L, B, H), lambda t: (0, 0, 0)),         # h0
                pl.BlockSpec((L, B, H), lambda t: (0, 0, 0)),         # c0
                pl.BlockSpec((H, P), lambda t: (0, 0)),               # fc_w (bf16, padded)
                pl.BlockSpec((1, P), lambda t: (0, 0)),               # fc_b (padded)
            ],
            out_specs=(
                pl.BlockSpec((1, B, P), lambda t: (t, 0, 0)),         # out[t]
                pl.BlockSpec((L, B, H), lambda t: (0, 0, 0)),         # h out (resident)
                pl.BlockSpec((L, B, H), lambda t: (0, 0, 0)),         # c out (resident)
            ),
        )
        call = pl.pallas_call(
            kernel,
            grid_spec=grid_spec,
            out_shape=(
                jax.ShapeDtypeStruct((T, B, P), jnp.float32),
                jax.ShapeDtypeStruct((L, B, H), jnp.float32),
                jax.ShapeDtypeStruct((L, B, H), jnp.float32),
            ),
            # Recurrent state updated in place: h -> h_out, c -> c_out.
            input_output_aliases={5: 1, 6: 2},
            compiler_params=pltpu.CompilerParams(
                dimension_semantics=("arbitrary",)),
        )
        self._calls[T] = call
        return call

    def forward_sequence(self, seq):
        """Process (T, batch, input_size) in a single pallas_call."""
        seq = jnp.asarray(seq, jnp.float32)
        T = seq.shape[0]
        call = self._get_call(T)
        out, h_new, c_new = call(seq, self.emb_w, self.emb_b, self.w, self.b,
                                 self.h, self.c, self.fc_w, self.fc_b)
        self.h, self.c = h_new, c_new
        return out[:, :, :self.output_size]

    def __call__(self, inp):
        # inp.view(-1, input_size) followed by a single recurrent step.
        x = jnp.asarray(inp, jnp.float32).reshape(-1, self.input_size)
        out = self.forward_sequence(x[None])
        return out[0]


def _reference_forward_sequence(model, seq, h, c):
    """Pure-JAX (non-Pallas) reference of the same fused/bf16 forward pass."""
    H = model.hidden_size
    seq = jnp.asarray(seq, jnp.float32)
    outs = []
    for t in range(seq.shape[0]):
        emb = (jnp.dot(seq[t].astype(jnp.bfloat16), model.emb_w,
                       preferred_element_type=jnp.float32) + model.emb_b)
        new_h, new_c = [], []
        for l in range(model.layers):
            xh = jnp.concatenate([emb, h[l]], axis=1).astype(jnp.bfloat16)
            gates = (jnp.dot(xh, model.w[l],
                             preferred_element_type=jnp.float32) + model.b[l])
            i_g = jax.nn.sigmoid(gates[:, 0 * H:1 * H])
            f_g = jax.nn.sigmoid(gates[:, 1 * H:2 * H])
            g_g = jnp.tanh(gates[:, 2 * H:3 * H])
            o_g = jax.nn.sigmoid(gates[:, 3 * H:4 * H])
            c_new = f_g * c[l] + i_g * g_g
            h_new = o_g * jnp.tanh(c_new)
            new_h.append(h_new)
            new_c.append(c_new)
            emb = h_new
        h = jnp.stack(new_h)
        c = jnp.stack(new_c)
        out = jnp.tanh(jnp.dot(emb.astype(jnp.bfloat16), model.fc_w,
                               preferred_element_type=jnp.float32) + model.fc_b)
        outs.append(out[:, :model.output_size])
    return jnp.stack(outs), h, c


if __name__ == "__main__":
    batch_size = 8
    input_size = 256     # e.g. concatenation of content + pose features
    hidden_size = 128
    output_size = 64
    layers = 2
    seq_len = 6

    key = jax.random.PRNGKey(0)
    k_param, k_seq, k_step = jax.random.split(key, 3)

    model = PallasLSTM(input_size, hidden_size, output_size, batch_size,
                       layers=layers, key=k_param)

    # --- multi-timestep path: seq_len steps fused into one pallas_call ---
    seq = jax.random.normal(k_seq, (seq_len, batch_size, input_size), jnp.float32)
    ref_out, ref_h, ref_c = _reference_forward_sequence(model, seq, model.h, model.c)

    out_seq = model.forward_sequence(seq)
    out_seq = jax.block_until_ready(out_seq)
    assert out_seq.shape == (seq_len, batch_size, output_size)
    assert jnp.allclose(out_seq, ref_out, atol=1e-2, rtol=1e-2)
    assert jnp.allclose(model.h, ref_h, atol=1e-2, rtol=1e-2)
    assert jnp.allclose(model.c, ref_c, atol=1e-2, rtol=1e-2)

    # --- single-step path (matches the PyTorch module's forward()) ---
    inp = jax.random.normal(k_step, (batch_size, input_size), jnp.float32)
    ref1, _, _ = _reference_forward_sequence(model, inp[None], model.h, model.c)
    out1 = model(inp)
    out1 = jax.block_until_ready(out1)
    assert out1.shape == (batch_size, output_size)
    assert jnp.allclose(out1, ref1[0], atol=1e-2, rtol=1e-2)

    print("KERNEL_OK")
</pallas_src>

<mosaic_0001>
module attributes {stable_mosaic.version = 11 : i64} {
  func.func @_lstm_seq_kernel(%arg0: i32, %arg1: memref<1x8x256xf32, #tpu.memory_space<vmem>>, %arg2: memref<256x128xbf16, #tpu.memory_space<vmem>>, %arg3: memref<1x128xf32, #tpu.memory_space<vmem>>, %arg4: memref<2x256x512xbf16, #tpu.memory_space<vmem>>, %arg5: memref<2x1x512xf32, #tpu.memory_space<vmem>>, %arg6: memref<2x8x128xf32, #tpu.memory_space<vmem>>, %arg7: memref<2x8x128xf32, #tpu.memory_space<vmem>>, %arg8: memref<128x128xbf16, #tpu.memory_space<vmem>>, %arg9: memref<1x128xf32, #tpu.memory_space<vmem>>, %arg10: memref<1x8x128xf32, #tpu.memory_space<vmem>>, %arg11: memref<2x8x128xf32, #tpu.memory_space<vmem>>, %arg12: memref<2x8x128xf32, #tpu.memory_space<vmem>>) attributes {dimension_semantics = [#tpu.dimension_semantics<arbitrary>], iteration_bounds = array<i64: 6>, scalar_prefetch = 0 : i64, scratch_operands = 0 : i64, tpu.core_type = #tpu.core_type<tc>, window_params = [{transform_indices = @transform_0, window_bounds = array<i64: 1, 8, 256>}, {pipeline_mode = #tpu.pipeline_mode<synchronous>, transform_indices = @transform_1, window_bounds = array<i64: 256, 128>}, {pipeline_mode = #tpu.pipeline_mode<synchronous>, transform_indices = @transform_2, window_bounds = array<i64: 1, 128>}, {pipeline_mode = #tpu.pipeline_mode<synchronous>, transform_indices = @transform_3, window_bounds = array<i64: 2, 256, 512>}, {pipeline_mode = #tpu.pipeline_mode<synchronous>, transform_indices = @transform_4, window_bounds = array<i64: 2, 1, 512>}, {pipeline_mode = #tpu.pipeline_mode<synchronous>, transform_indices = @transform_5, window_bounds = array<i64: 2, 8, 128>}, {pipeline_mode = #tpu.pipeline_mode<synchronous>, transform_indices = @transform_6, window_bounds = array<i64: 2, 8, 128>}, {pipeline_mode = #tpu.pipeline_mode<synchronous>, transform_indices = @transform_7, window_bounds = array<i64: 128, 128>}, {pipeline_mode = #tpu.pipeline_mode<synchronous>, transform_indices = @transform_8, window_bounds = array<i64: 1, 128>}, {transform_indices = @transform_9, window_bounds = array<i64: 1, 8, 128>}, {pipeline_mode = #tpu.pipeline_mode<synchronous>, transform_indices = @transform_10, window_bounds = array<i64: 2, 8, 128>}, {pipeline_mode = #tpu.pipeline_mode<synchronous>, transform_indices = @transform_11, window_bounds = array<i64: 2, 8, 128>}]} {
    %c0_i32 = arith.constant 0 : i32
    %0 = arith.cmpi eq, %arg0, %c0_i32 : i32
    %1 = arith.extui %0 : i1 to i32
    %c0_i32_0 = arith.constant 0 : i32
    %2 = arith.cmpi ne, %1, %c0_i32_0 : i32
    scf.if %2 {
      %c0_58 = arith.constant 0 : index
      %c0_59 = arith.constant 0 : index
      %c0_60 = arith.constant 0 : index
      %109 = vector.load %arg6[%c0_58, %c0_59, %c0_60] : memref<2x8x128xf32, #tpu.memory_space<vmem>>, vector<2x8x128xf32>
      %c0_61 = arith.constant 0 : index
      %c0_62 = arith.constant 0 : index
      %c0_63 = arith.constant 0 : index
      %110 = vector.load %arg11[%c0_61, %c0_62, %c0_63] : memref<2x8x128xf32, #tpu.memory_space<vmem>>, vector<2x8x128xf32>
      tpu.vector_store %arg11[%c0_61, %c0_62, %c0_63], %109 {strides = array<i32>} : memref<2x8x128xf32, #tpu.memory_space<vmem>>, vector<2x8x128xf32>,
      %c0_64 = arith.constant 0 : index
      %c0_65 = arith.constant 0 : index
      %c0_66 = arith.constant 0 : index
      %111 = vector.load %arg7[%c0_64, %c0_65, %c0_66] : memref<2x8x128xf32, #tpu.memory_space<vmem>>, vector<2x8x128xf32>
      %c0_67 = arith.constant 0 : index
      %c0_68 = arith.constant 0 : index
      %c0_69 = arith.constant 0 : index
      %112 = vector.load %arg12[%c0_67, %c0_68, %c0_69] : memref<2x8x128xf32, #tpu.memory_space<vmem>>, vector<2x8x128xf32>
      tpu.vector_store %arg12[%c0_67, %c0_68, %c0_69], %111 {strides = array<i32>} : memref<2x8x128xf32, #tpu.memory_space<vmem>>, vector<2x8x128xf32>,
    } else {
    }
    %c0 = arith.constant 0 : index
    %c0_1 = arith.constant 0 : index
    %c0_2 = arith.constant 0 : index
    %3 = vector.load %arg1[%c0, %c0_1, %c0_2] : memref<1x8x256xf32, #tpu.memory_space<vmem>>, vector<1x8x256xf32>
    %4 = vector.shape_cast %3 : vector<1x8x256xf32> to vector<8x256xf32>
    %5 = arith.truncf %4 : vector<8x256xf32> to vector<8x256xbf16>
    %c0_3 = arith.constant 0 : index
    %c0_4 = arith.constant 0 : index
    %6 = vector.load %arg2[%c0_3, %c0_4] : memref<256x128xbf16, #tpu.memory_space<vmem>>, vector<256x128xbf16>
    %cst = arith.constant dense<0.000000e+00> : vector<8x128xf32>
    %7 = tpu.matmul %5, %6, %cst {dimension_numbers = #tpu.dot_dimension_numbers<[1], [0], [0], [1], [0, 0, 1, 1], [], []>} : vector<8x256xbf16>, vector<256x128xbf16>, vector<8x128xf32> -> vector<8x128xf32>
    %c0_5 = arith.constant 0 : index
    %c0_6 = arith.constant 0 : index
    %8 = vector.load %arg3[%c0_5, %c0_6] : memref<1x128xf32, #tpu.memory_space<vmem>>, vector<1x128xf32>
    %9 = vector.broadcast %8 : vector<1x128xf32> to vector<8x128xf32>
    %10 = arith.addf %7, %9 : vector<8x128xf32>
    %c0_7 = arith.constant 0 : index
    %c0_8 = arith.constant 0 : index
    %c0_9 = arith.constant 0 : index
    %11 = vector.load %arg11[%c0_7, %c0_8, %c0_9] : memref<2x8x128xf32, #tpu.memory_space<vmem>>, vector<1x8x128xf32>
    %12 = vector.shape_cast %11 : vector<1x8x128xf32> to vector<8x128xf32>
    %c0_10 = arith.constant 0 : index
    %c0_11 = arith.constant 0 : index
    %c0_12 = arith.constant 0 : index
    %13 = vector.load %arg12[%c0_10, %c0_11, %c0_12] : memref<2x8x128xf32, #tpu.memory_space<vmem>>, vector<1x8x128xf32>
    %14 = vector.shape_cast %13 : vector<1x8x128xf32> to vector<8x128xf32>
    %15 = tpu.concatenate %10, %12 in 1 : vector<8x128xf32>, vector<8x128xf32> -> vector<8x256xf32>
    %16 = arith.truncf %15 : vector<8x256xf32> to vector<8x256xbf16>
    %c0_13 = arith.constant 0 : index
    %c0_14 = arith.constant 0 : index
    %c0_15 = arith.constant 0 : index
    %17 = vector.load %arg4[%c0_13, %c0_14, %c0_15] : memref<2x256x512xbf16, #tpu.memory_space<vmem>>, vector<1x256x512xbf16>
    %18 = vector.shape_cast %17 : vector<1x256x512xbf16> to vector<256x512xbf16>
    %cst_16 = arith.constant dense<0.000000e+00> : vector<8x512xf32>
    %19 = tpu.matmul %16, %18, %cst_16 {dimension_numbers = #tpu.dot_dimension_numbers<[1], [0], [0], [1], [0, 0, 1, 1], [], []>} : vector<8x256xbf16>, vector<256x512xbf16>, vector<8x512xf32> -> vector<8x512xf32>
    %c0_17 = arith.constant 0 : index
    %c0_18 = arith.constant 0 : index
    %c0_19 = arith.constant 0 : index
    %20 = vector.load %arg5[%c0_17, %c0_18, %c0_19] : memref<2x1x512xf32, #tpu.memory_space<vmem>>, vector<1x1x512xf32>
    %21 = vector.shape_cast %20 : vector<1x1x512xf32> to vector<1x512xf32>
    %22 = vector.broadcast %21 : vector<1x512xf32> to vector<8x512xf32>
    %23 = arith.addf %19, %22 : vector<8x512xf32>
    %24 = vector.extract_strided_slice %23 {offsets = [0, 0], sizes = [8, 128], strides = [1, 1]} : vector<8x512xf32> to vector<8x128xf32>
    %25 = arith.negf %24 : vector<8x128xf32>
    %26 = math.exp %25 : vector<8x128xf32>
    %cst_20 = arith.constant 1.000000e+00 : f32
    %27 = vector.broadcast %cst_20 : f32 to vector<8x128xf32>
    %28 = arith.addf %27, %26 : vector<8x128xf32>
    %29 = arith.divf %27, %28 : vector<8x128xf32>
    %30 = vector.extract_strided_slice %23 {offsets = [0, 128], sizes = [8, 128], strides = [1, 1]} : vector<8x512xf32> to vector<8x128xf32>
    %31 = arith.negf %30 : vector<8x128xf32>
    %32 = math.exp %31 : vector<8x128xf32>
    %cst_21 = arith.constant 1.000000e+00 : f32
    %33 = vector.broadcast %cst_21 : f32 to vector<8x128xf32>
    %34 = arith.addf %33, %32 : vector<8x128xf32>
    %35 = arith.divf %33, %34 : vector<8x128xf32>
    %36 = vector.extract_strided_slice %23 {offsets = [0, 256], sizes = [8, 128], strides = [1, 1]} : vector<8x512xf32> to vector<8x128xf32>
    %37 = math.tanh %36 : vector<8x128xf32>
    %38 = vector.extract_strided_slice %23 {offsets = [0, 384], sizes = [8, 128], strides = [1, 1]} : vector<8x512xf32> to vector<8x128xf32>
    %39 = arith.negf %38 : vector<8x128xf32>
    %40 = math.exp %39 : vector<8x128xf32>
    %cst_22 = arith.constant 1.000000e+00 : f32
    %41 = vector.broadcast %cst_22 : f32 to vector<8x128xf32>
    %42 = arith.addf %41, %40 : vector<8x128xf32>
    %43 = arith.divf %41, %42 : vector<8x128xf32>
    %44 = arith.mulf %35, %14 : vector<8x128xf32>
    %45 = arith.mulf %29, %37 : vector<8x128xf32>
    %46 = arith.addf %44, %45 : vector<8x128xf32>
    %47 = math.tanh %46 : vector<8x128xf32>
    %48 = arith.mulf %43, %47 : vector<8x128xf32>
    %c0_23 = arith.constant 0 : index
    %c0_24 = arith.constant 0 : index
    %c0_25 = arith.constant 0 : index
    %49 = vector.load %arg11[%c0_23, %c0_24, %c0_25] : memref<2x8x128xf32, #tpu.memory_space<vmem>>, vector<1x8x128xf32>
    %50 = vector.shape_cast %49 : vector<1x8x128xf32> to vector<8x128xf32>
    %51 = vector.shape_cast %48 : vector<8x128xf32> to vector<1x8x128xf32>
    tpu.vector_store %arg11[%c0_23, %c0_24, %c0_25], %51 {strides = array<i32>} : memref<2x8x128xf32, #tpu.memory_space<vmem>>, vector<1x8x128xf32>,
    %c0_26 = arith.constant 0 : index
    %c0_27 = arith.constant 0 : index
    %c0_28 = arith.constant 0 : index
    %52 = vector.load %arg12[%c0_26, %c0_27, %c0_28] : memref<2x8x128xf32, #tpu.memory_space<vmem>>, vector<1x8x128xf32>
    %53 = vector.shape_cast %52 : vector<1x8x128xf32> to vector<8x128xf32>
    %54 = vector.shape_cast %46 : vector<8x128xf32> to vector<1x8x128xf32>
    tpu.vector_store %arg12[%c0_26, %c0_27, %c0_28], %54 {strides = array<i32>} : memref<2x8x128xf32, #tpu.memory_space<vmem>>, vector<1x8x128xf32>,
    %c1 = arith.constant 1 : index
    %c0_29 = arith.constant 0 : index
    %c0_30 = arith.constant 0 : index
    %55 = vector.load %arg11[%c1, %c0_29, %c0_30] : memref<2x8x128xf32, #tpu.memory_space<vmem>>, vector<1x8x128xf32>
    %56 = vector.shape_cast %55 : vector<1x8x128xf32> to vector<8x128xf32>
    %c1_31 = arith.constant 1 : index
    %c0_32 = arith.constant 0 : index
    %c0_33 = arith.constant 0 : index
    %57 = vector.load %arg12[%c1_31, %c0_32, %c0_33] : memref<2x8x128xf32, #tpu.memory_space<vmem>>, vector<1x8x128xf32>
    %58 = vector.shape_cast %57 : vector<1x8x128xf32> to vector<8x128xf32>
    %59 = tpu.concatenate %48, %56 in 1 : vector<8x128xf32>, vector<8x128xf32> -> vector<8x256xf32>
    %60 = arith.truncf %59 : vector<8x256xf32> to vector<8x256xbf16>
    %c1_34 = arith.constant 1 : index
    %c0_35 = arith.constant 0 : index
    %c0_36 = arith.constant 0 : index
    %61 = vector.load %arg4[%c1_34, %c0_35, %c0_36] : memref<2x256x512xbf16, #tpu.memory_space<vmem>>, vector<1x256x512xbf16>
    %62 = vector.shape_cast %61 : vector<1x256x512xbf16> to vector<256x512xbf16>
    %cst_37 = arith.constant dense<0.000000e+00> : vector<8x512xf32>
    %63 = tpu.matmul %60, %62, %cst_37 {dimension_numbers = #tpu.dot_dimension_numbers<[1], [0], [0], [1], [0, 0, 1, 1], [], []>} : vector<8x256xbf16>, vector<256x512xbf16>, vector<8x512xf32> -> vector<8x512xf32>
    %c1_38 = arith.constant 1 : index
    %c0_39 = arith.constant 0 : index
    %c0_40 = arith.constant 0 : index
    %64 = vector.load %arg5[%c1_38, %c0_39, %c0_40] : memref<2x1x512xf32, #tpu.memory_space<vmem>>, vector<1x1x512xf32>
    %65 = vector.shape_cast %64 : vector<1x1x512xf32> to vector<1x512xf32>
    %66 = vector.broadcast %65 : vector<1x512xf32> to vector<8x512xf32>
    %67 = arith.addf %63, %66 : vector<8x512xf32>
    %68 = vector.extract_strided_slice %67 {offsets = [0, 0], sizes = [8, 128], strides = [1, 1]} : vector<8x512xf32> to vector<8x128xf32>
    %69 = arith.negf %68 : vector<8x128xf32>
    %70 = math.exp %69 : vector<8x128xf32>
    %cst_41 = arith.constant 1.000000e+00 : f32
    %71 = vector.broadcast %cst_41 : f32 to vector<8x128xf32>
    %72 = arith.addf %71, %70 : vector<8x128xf32>
    %73 = arith.divf %71, %72 : vector<8x128xf32>
    %74 = vector.extract_strided_slice %67 {offsets = [0, 128], sizes = [8, 128], strides = [1, 1]} : vector<8x512xf32> to vector<8x128xf32>
    %75 = arith.negf %74 : vector<8x128xf32>
    %76 = math.exp %75 : vector<8x128xf32>
    %cst_42 = arith.constant 1.000000e+00 : f32
    %77 = vector.broadcast %cst_42 : f32 to vector<8x128xf32>
    %78 = arith.addf %77, %76 : vector<8x128xf32>
    %79 = arith.divf %77, %78 : vector<8x128xf32>
    %80 = vector.extract_strided_slice %67 {offsets = [0, 256], sizes = [8, 128], strides = [1, 1]} : vector<8x512xf32> to vector<8x128xf32>
    %81 = math.tanh %80 : vector<8x128xf32>
    %82 = vector.extract_strided_slice %67 {offsets = [0, 384], sizes = [8, 128], strides = [1, 1]} : vector<8x512xf32> to vector<8x128xf32>
    %83 = arith.negf %82 : vector<8x128xf32>
    %84 = math.exp %83 : vector<8x128xf32>
    %cst_43 = arith.constant 1.000000e+00 : f32
    %85 = vector.broadcast %cst_43 : f32 to vector<8x128xf32>
    %86 = arith.addf %85, %84 : vector<8x128xf32>
    %87 = arith.divf %85, %86 : vector<8x128xf32>
    %88 = arith.mulf %79, %58 : vector<8x128xf32>
    %89 = arith.mulf %73, %81 : vector<8x128xf32>
    %90 = arith.addf %88, %89 : vector<8x128xf32>
    %91 = math.tanh %90 : vector<8x128xf32>
    %92 = arith.mulf %87, %91 : vector<8x128xf32>
    %c1_44 = arith.constant 1 : index
    %c0_45 = arith.constant 0 : index
    %c0_46 = arith.constant 0 : index
    %93 = vector.load %arg11[%c1_44, %c0_45, %c0_46] : memref<2x8x128xf32, #tpu.memory_space<vmem>>, vector<1x8x128xf32>
    %94 = vector.shape_cast %93 : vector<1x8x128xf32> to vector<8x128xf32>
    %95 = vector.shape_cast %92 : vector<8x128xf32> to vector<1x8x128xf32>
    tpu.vector_store %arg11[%c1_44, %c0_45, %c0_46], %95 {strides = array<i32>} : memref<2x8x128xf32, #tpu.memory_space<vmem>>, vector<1x8x128xf32>,
    %c1_47 = arith.constant 1 : index
    %c0_48 = arith.constant 0 : index
    %c0_49 = arith.constant 0 : index
    %96 = vector.load %arg12[%c1_47, %c0_48, %c0_49] : memref<2x8x128xf32, #tpu.memory_space<vmem>>, vector<1x8x128xf32>
    %97 = vector.shape_cast %96 : vector<1x8x128xf32> to vector<8x128xf32>
    %98 = vector.shape_cast %90 : vector<8x128xf32> to vector<1x8x128xf32>
    tpu.vector_store %arg12[%c1_47, %c0_48, %c0_49], %98 {strides = array<i32>} : memref<2x8x128xf32, #tpu.memory_space<vmem>>, vector<1x8x128xf32>,
    %99 = arith.truncf %92 : vector<8x128xf32> to vector<8x128xbf16>
    %c0_50 = arith.constant 0 : index
    %c0_51 = arith.constant 0 : index
    %100 = vector.load %arg8[%c0_50, %c0_51] : memref<128x128xbf16, #tpu.memory_space<vmem>>, vector<128x128xbf16>
    %cst_52 = arith.constant dense<0.000000e+00> : vector<8x128xf32>
    %101 = tpu.matmul %99, %100, %cst_52 {dimension_numbers = #tpu.dot_dimension_numbers<[1], [0], [0], [1], [0, 0, 1, 1], [], []>} : vector<8x128xbf16>, vector<128x128xbf16>, vector<8x128xf32> -> vector<8x128xf32>
    %c0_53 = arith.constant 0 : index
    %c0_54 = arith.constant 0 : index
    %102 = vector.load %arg9[%c0_53, %c0_54] : memref<1x128xf32, #tpu.memory_space<vmem>>, vector<1x128xf32>
    %103 = vector.broadcast %102 : vector<1x128xf32> to vector<8x128xf32>
    %104 = arith.addf %101, %103 : vector<8x128xf32>
    %105 = math.tanh %104 : vector<8x128xf32>
    %c0_55 = arith.constant 0 : index
    %c0_56 = arith.constant 0 : index
    %c0_57 = arith.constant 0 : index
    %106 = vector.load %arg10[%c0_55, %c0_56, %c0_57] : memref<1x8x128xf32, #tpu.memory_space<vmem>>, vector<1x8x128xf32>
    %107 = vector.shape_cast %106 : vector<1x8x128xf32> to vector<8x128xf32>
    %108 = vector.shape_cast %105 : vector<8x128xf32> to vector<1x8x128xf32>
    tpu.vector_store %arg10[%c0_55, %c0_56, %c0_57], %108 {strides = array<i32>} : memref<1x8x128xf32, #tpu.memory_space<vmem>>, vector<1x8x128xf32>,
    return
  }
  func.func @transform_0(%arg0: i32) -> (i32, i32, i32) {
    %c0_i32 = arith.constant 0 : i32
    %c0_i32_0 = arith.constant 0 : i32
    %c0_i32_1 = arith.constant 0 : i32
    return %arg0, %c0_i32, %c0_i32_0 : i32, i32, i32
  }
  func.func @transform_1(%arg0: i32) -> (i32, i32) {
    %c0_i32 = arith.constant 0 : i32
    %c0_i32_0 = arith.constant 0 : i32
    %c0_i32_1 = arith.constant 0 : i32
    return %c0_i32, %c0_i32_0 : i32, i32
  }
  func.func @transform_2(%arg0: i32) -> (i32, i32) {
    %c0_i32 = arith.constant 0 : i32
    %c0_i32_0 = arith.constant 0 : i32
    %c0_i32_1 = arith.constant 0 : i32
    return %c0_i32, %c0_i32_0 : i32, i32
  }
  func.func @transform_3(%arg0: i32) -> (i32, i32, i32) {
    %c0_i32 = arith.constant 0 : i32
    %c0_i32_0 = arith.constant 0 : i32
    %c0_i32_1 = arith.constant 0 : i32
    %c0_i32_2 = arith.constant 0 : i32
    return %c0_i32, %c0_i32_0, %c0_i32_1 : i32, i32, i32
  }
  func.func @transform_4(%arg0: i32) -> (i32, i32, i32) {
    %c0_i32 = arith.constant 0 : i32
    %c0_i32_0 = arith.constant 0 : i32
    %c0_i32_1 = arith.constant 0 : i32
    %c0_i32_2 = arith.constant 0 : i32
    return %c0_i32, %c0_i32_0, %c0_i32_1 : i32, i32, i32
  }
  func.func @transform_5(%arg0: i32) -> (i32, i32, i32) {
    %c0_i32 = arith.constant 0 : i32
    %c0_i32_0 = arith.constant 0 : i32
    %c0_i32_1 = arith.constant 0 : i32
    %c0_i32_2 = arith.constant 0 : i32
    return %c0_i32, %c0_i32_0, %c0_i32_1 : i32, i32, i32
  }
  func.func @transform_6(%arg0: i32) -> (i32, i32, i32) {
    %c0_i32 = arith.constant 0 : i32
    %c0_i32_0 = arith.constant 0 : i32
    %c0_i32_1 = arith.constant 0 : i32
    %c0_i32_2 = arith.constant 0 : i32
    return %c0_i32, %c0_i32_0, %c0_i32_1 : i32, i32, i32
  }
  func.func @transform_7(%arg0: i32) -> (i32, i32) {
    %c0_i32 = arith.constant 0 : i32
    %c0_i32_0 = arith.constant 0 : i32
    %c0_i32_1 = arith.constant 0 : i32
    return %c0_i32, %c0_i32_0 : i32, i32
  }
  func.func @transform_8(%arg0: i32) -> (i32, i32) {
    %c0_i32 = arith.constant 0 : i32
    %c0_i32_0 = arith.constant 0 : i32
    %c0_i32_1 = arith.constant 0 : i32
    return %c0_i32, %c0_i32_0 : i32, i32
  }
  func.func @transform_9(%arg0: i32) -> (i32, i32, i32) {
    %c0_i32 = arith.constant 0 : i32
    %c0_i32_0 = arith.constant 0 : i32
    %c0_i32_1 = arith.constant 0 : i32
    return %arg0, %c0_i32, %c0_i32_0 : i32, i32, i32
  }
  func.func @transform_10(%arg0: i32) -> (i32, i32, i32) {
    %c0_i32 = arith.constant 0 : i32
    %c0_i32_0 = arith.constant 0 : i32
    %c0_i32_1 = arith.constant 0 : i32
    %c0_i32_2 = arith.constant 0 : i32
    return %c0_i32, %c0_i32_0, %c0_i32_1 : i32, i32, i32
  }
  func.func @transform_11(%arg0: i32) -> (i32, i32, i32) {
    %c0_i32 = arith.constant 0 : i32
    %c0_i32_0 = arith.constant 0 : i32
    %c0_i32_1 = arith.constant 0 : i32
    %c0_i32_2 = arith.constant 0 : i32
    return %c0_i32, %c0_i32_0, %c0_i32_1 : i32, i32, i32
  }
}

</mosaic_0001>

<bundles_post_ra>
// kernel: tpu_custom_call.1
= control target key start
LH: loop header
LB: loop body
LE: loop exit
PB: predicated region body
PF: predicated region fallthrough
CT: control target
= control target key end

     0   :  { %s3333_s0 = inlined_call_operand.hbm [shape: f32[6,8,256], index: 0, kind: input, shape index: {}]   ;;  %s3334_s1 = inlined_call_operand.hbm [shape: bf16[256,128], index: 1, kind: input, shape index: {}]   ;;  %s3335_s2 = inlined_call_operand.vmem [shape: f32[1,128], index: 2, kind: input, shape index: {}]   ;;  %s3336_s3 = inlined_call_operand.hbm [shape: bf16[2,256,512], index: 3, kind: input, shape index: {}]   ;;  %s3337_s4 = inlined_call_operand.hbm [shape: f32[2,1,512], index: 4, kind: input, shape index: {}]   ;;  %s3338_s5 = inlined_call_operand.hbm [shape: f32[2,8,128], index: 5, kind: input, shape index: {}, may-alias: {5,10}]   ;;  %s3339_s6 = inlined_call_operand.hbm [shape: f32[2,8,128], index: 6, kind: input, shape index: {}, may-alias: {6,11}]   ;;  %s3340_s7 = inlined_call_operand.vmem [shape: bf16[128,128], index: 7, kind: input, shape index: {}]   ;;  %s3341_s8 = inlined_call_operand.hbm [shape: f32[1,128], index: 8, kind: input, shape index: {}]   ;;  %s3342_s9 = inlined_call_operand.hbm [shape: f32[6,8,128], index: 9, kind: output, shape index: {0}]   ;;  %s3343_s10 = inlined_call_operand.hbm [shape: f32[2,8,128], index: 10, kind: output, shape index: {1}, may-alias: {5,10}]   ;;  %s3344_s11 = inlined_call_operand.hbm [shape: f32[2,8,128], index: 11, kind: output, shape index: {2}, may-alias: {6,11}]  }
   0x1   :  { %3352 = sst [smem:[#allocation24_spill]] %s3334_s1 }
   0x2   :  { %3353 = sst [smem:[#allocation25_spill]] %s3336_s3 }
   0x3   :  { %3354 = sst [smem:[#allocation26_spill]] %s3337_s4 }
   0x4   :  { %3355 = sst [smem:[#allocation27_spill]] %s3338_s5 }
   0x5   :  { %3356 = sst [smem:[#allocation28_spill]] %s3339_s6 }
   0x6   :  { %3357 = sst [smem:[#allocation29_spill]] %s3341_s8 }
   0x7   :  { %17 = vsyncpa [#allocation3], 0 }
   0x8   :  { %19 = vsyncpa [#allocation3 + $0x1], 0 }
   0x9   :  { %20 = vsyncpa [#allocation6], 0 }
   0xa   :  { %21 = vsyncpa [#allocation9], 0 }
   0xb   :  { %22 = vsyncpa [#allocation12], 0 }
   0xc   :  { %23 = vsyncpa [#allocation4], 0 }
   0xd   :  { %25 = vsyncpa [#allocation4 + $0x1], 0 }
   0xe   :  { %26 = vsyncpa [#allocation16], 0  ;;  %s3035_s17 = smov 0   ;;  %s3037_s18 = smov 0  }
   0xf   :  { %s3039_s19 = smov 0   ;;  %s3041_s20 = smov 0  }
  0x10 LB: > { %s2955_s21 = smov [#allocation5]   ;;  %s3056_s23 = sadd.s32 4294967295, %s2953_s20   ;;  %s2953_s20 = sphi %s3041_s20, %s3395_s20   ;;  %s2949_s19 = sphi %s3039_s19, %s3394_s19   ;;  %s2945_s18 = sphi %s3037_s18, %s3393_s18   ;;  %s2941_s17 = sphi %s3035_s17, %s3392_s17  }
  0x11   : > { %s311_s22 = sshll.u32 %s2955_s21, 4  ;;  %p2019_p0 = scmp.ge.s32.totalorder %s2953_s20, 1  ;;  %s312_s22 = int_to_ptr.vmem [resolvable:$true] %s311_s22 }
  0x12   : > { %p3345_p1 = scmp.eq.s32.totalorder %s3056_s23, 0  ;;  %p299_p2 = scmp.lt.s32.totalorder %s2953_s20, 7 }
  0x13   : > { %s2956_s25 = smov [#allocation8]   ;;  %s2957_s28 = smov [#allocation11]  }
  0x14   : > { %p3062_p4 = pnand %p2019_p0, %p299_p2  ;;  %s340_s26 = sshll.u32 %s2956_s25, 4  ;;  %s341_s26 = int_to_ptr.vmem [resolvable:$true] %s340_s26 }
  0x15   : > { %s366_s29 = sshll.u32 %s2957_s28, 4  ;;  %s2652_s12 = scalar_lea.vmem %s312_s22, 2048  ;;  %s367_s29 = int_to_ptr.vmem [resolvable:$true] %s366_s29 }
  0x16   : > { %s3358_s24 = scalar_select %p3062_p4, 1, 0 }
  0x17   : > { %p2296_p5 = pneg %p3062_p4  ;;  %p2653_p8 = scmp.ne.s32.totalorder %s312_s22, %s2652_s12 }
  0x18   : > { %p2660_p11 = scmp.lt.s32.totalorder %s312_s22, %s312_s22  ;;  %p2661_p12 = scmp.lt.s32.totalorder %s2652_s12, %s2652_s12 }
  0x19   : > { %p3070_p6 = pnand %p2296_p5, %p3345_p1 }
  0x1a   : > { %p2662_p13 = por %p2661_p12, %p2660_p11 }
  0x1b   : > { %p3076_p7 = pneg %p3070_p6 }
  0x1d   : > { %p2655_p9 = pnand %p2653_p8, %p3076_p7 }
  0x1f   : > { %p2656_p10 = pneg %p2655_p9 }
  0x21   : > { %p2663_p0 = pnand %p2662_p13, %p2656_p10 }
  0x23   : > { %2666 = shalt.err (!%p2663_p0)
}
  0x24   : > { %s2958_s13 = smov 64   ;;  %s2959_s14 = smov 4  }
  0x25   : > { %s3361_s1 = sld [smem:[#allocation24_spill]]  ;;  %s2678_s21 = scalar_lea.vmem %s341_s26, 128 }
  0x26   : > { %p2679_p2 = scmp.ne.s32.totalorder %s341_s26, %s2678_s21  ;;  %p2686_p9 = scmp.lt.s32.totalorder %s341_s26, %s341_s26 }
  0x27   : > { %p2687_p3 = scmp.lt.s32.totalorder %s2678_s21, %s2678_s21 }
  0x28   : > { %p2681_p5 = pnand %p2679_p2, %p3076_p7 }
  0x29   : > { %p2688_p1 = por %p2687_p3, %p2686_p9 }
  0x2a   : > { %p2682_p8 = pneg %p2681_p5 }
  0x2b   : > { %2299 = dma.hbm_to_vmem [thread:$0]  (!%p3070_p6), %s3361_s1, 2048, %s312_s22, [#allocation6], %s2958_s13, %s2958_s13, %s2959_s14  }
  0x2c   : > { %p2689_p11 = pnand %p2688_p1, %p2682_p8 }
  0x2e   : > { %2692 = shalt.err (!%p2689_p11)
}
  0x2f   : > { %s3362_s4 = sld [smem:[#allocation26_spill]]  ;;  %s2704_s12 = scalar_lea.vmem %s367_s29, 256 }
  0x30   : > { %p2705_p10 = scmp.ne.s32.totalorder %s367_s29, %s2704_s12  ;;  %p2712_p0 = scmp.lt.s32.totalorder %s367_s29, %s367_s29 }
  0x31   : > { %p2713_p2 = scmp.lt.s32.totalorder %s2704_s12, %s2704_s12 }
  0x32   : > { %p2707_p12 = pnand %p2705_p10, %p3076_p7 }
  0x33   : > { %p2714_p5 = por %p2713_p2, %p2712_p0 }
  0x34   : > { %p2708_p13 = pneg %p2707_p12 }
  0x35   : > { %2305 = dma.hbm_to_vmem [thread:$0]  (!%p3070_p6), %s3362_s4, 128, %s341_s26, [#allocation9], %s2958_s13, %s2958_s13, %s2959_s14  }
  0x36   : > { %p2715_p4 = pnand %p2714_p5, %p2708_p13 }
  0x38   : > { %2718 = shalt.err (!%p2715_p4)
}
  0x39   : > { %s3347_s22 = smov 128   ;;  %s3348_s15 = smov 8  }
  0x3a   : > { %s3363_s6 = sld [smem:[#allocation28_spill]]  ;;  %s2962_s14 = smov [#allocation7]  }
  0x3b   : > { %s327_s16 = sshll.u32 %s2962_s14, 4  ;;  %s328_s16 = int_to_ptr.vmem [resolvable:$true] %s327_s16 }
  0x3c   : > { %s2730_s21 = scalar_lea.vmem %s328_s16, 16384  ;;  %p2738_p8 = scmp.lt.s32.totalorder %s328_s16, %s328_s16 }
  0x3d   : > { %p2731_p1 = scmp.ne.s32.totalorder %s328_s16, %s2730_s21  ;;  %p2739_p9 = scmp.lt.s32.totalorder %s2730_s21, %s2730_s21 }
  0x3f   : > { %p2733_p3 = pnand %p2731_p1, %p3076_p7  ;;  %p2740_p11 = por %p2739_p9, %p2738_p8 }
  0x40   : > { %2311 = dma.hbm_to_vmem [thread:$0]  (!%p3070_p6), %s3363_s6, 256, %s367_s29, [#allocation12], %s3347_s22, %s3347_s22, %s3348_s15  }
  0x41   : > { %p2734_p4 = pneg %p2733_p3 }
  0x43   : > { %p2741_p10 = pnand %p2740_p11, %p2734_p4 }
  0x45   : > { %2744 = shalt.err (!%p2741_p10)
}
  0x46   : > { %s2963_s25 = smov 256   ;;  %s2964_s28 = smov 16  }
  0x47   : > { %s3364_s3 = sld [smem:[#allocation25_spill]]  ;;  %s2965_s26 = smov [#allocation10]  }
  0x48   : > { %s353_s13 = sshll.u32 %s2965_s26, 4  ;;  %s2966_s14 = smov [#allocation13]   ;;  %s354_s13 = int_to_ptr.vmem [resolvable:$true] %s353_s13 }
  0x49   : > { %s383_s22 = sshll.u32 %s2966_s14, 4  ;;  %s2756_s15 = scalar_lea.vmem %s354_s13, 256  ;;  %s384_s22 = int_to_ptr.vmem [resolvable:$true] %s383_s22 }
  0x4a   : > { %p2757_p12 = scmp.ne.s32.totalorder %s354_s13, %s2756_s15  ;;  %p2764_p2 = scmp.lt.s32.totalorder %s354_s13, %s354_s13 }
  0x4b   : > { %p2765_p5 = scmp.lt.s32.totalorder %s2756_s15, %s2756_s15 }
  0x4c   : > { %p2759_p13 = pnand %p2757_p12, %p3076_p7 }
  0x4d   : > { %2302 = dma.hbm_to_vmem [thread:$0]  (!%p3070_p6), %s3364_s3, 16384, %s328_s16, [#allocation6], %s2963_s25, %s2963_s25, %s2964_s28  }
  0x4e   : > { %p2760_p0 = pneg %p2759_p13  ;;  %p2766_p1 = por %p2765_p5, %p2764_p2 }
  0x50   : > { %p2767_p3 = pnand %p2766_p1, %p2760_p0 }
  0x52   : > { %2770 = shalt.err (!%p2767_p3)
}
  0x53   : > { %s3365_s21 = smov 8   ;;  %s3366_s16 = smov 128  }
  0x54   : > { %s3367_s5 = sld [smem:[#allocation27_spill]]  ;;  %s2782_s12 = scalar_lea.vmem %s384_s22, 16 }
  0x55   : > { %p2783_p4 = scmp.ne.s32.totalorder %s384_s22, %s2782_s12  ;;  %s2789_s29 = scalar_lea.vmem %s384_s22, 32 }
  0x56   : > { %p2790_p11 = scmp.lt.s32.totalorder %s384_s22, %s384_s22  ;;  %p2791_p10 = scmp.lt.s32.totalorder %s2789_s29, %s2782_s12 }
  0x57   : > { %p2785_p8 = pnand %p2783_p4, %p3076_p7 }
  0x58   : > { %p2792_p12 = por %p2791_p10, %p2790_p11 }
  0x59   : > { %p2786_p9 = pneg %p2785_p8 }
  0x5a   : > { %2308 = dma.hbm_to_vmem [thread:$0]  (!%p3070_p6), %s3367_s5, 256, %s354_s13, [#allocation9], %s3366_s16, %s3366_s16, %s3365_s21  }
  0x5b   : > { %p2793_p13 = pnand %p2792_p12, %p2786_p9 }
  0x5d   : > { %2796 = shalt.err (!%p2793_p13)
}
  0x5e   : > { %s3368_s8 = sld [smem:[#allocation29_spill]]  ;;  %s2018_s27 = sadd.s32 4294967294, %s2953_s20  }
  0x5f   : > { %s3130_s30 = sadd.s32 1, %s2953_s20   ;;  %s39_s14 = sadd.s32 1, %s2949_s19 }
  0x60   : > { %s36_s13 = ssub.s32 %s2953_s20, %s3130_s30  ;;  %p46_p0 = scmp.ne.s32.totalorder %s2949_s19, %s2945_s18 }
  0x61   : > { %p37_p7 = scmp.eq.s32.totalorder %s36_s13, 0  ;;  %p47_p2 = scmp.eq.s32.totalorder %s2953_s20, 0 }
  0x62   : > { %p52_p5 = scmp.ne.s32.totalorder %s2945_s18, %s2941_s17  ;;  %p3370_p3 = scmp.eq.s32.totalorder %s3056_s23, 0 }
  0x63   : > { %s3141_s21 = scalar_select %p37_p7, %s2949_s19, %s39_s14  }
  0x64   : > { %2314 = dma.hbm_to_vmem [thread:$0]  (!%p3070_p6), %s3368_s8, 16, %s384_s22, [#allocation12]  }
  0x65   : > { %p3143_p1 = por %p47_p2, %p46_p0  ;;  %p3149_p6 = por %p3370_p3, %p52_p5 }
  0x66   : > { %p3349_p4 = scmp.eq.s32.totalorder %s3056_s23, 5  ;;  %p250_p8 = scmp.eq.s32.totalorder %s2018_s27, 5 }
  0x67   : > { %s3371_s22 = scalar_select %p3149_p6, 1, 0 }
  0x68   : > { %p2329_p9 = scmp.lt.s32.totalorder %s2953_s20, 6  ;;  %s394_s25 = sand.u32 1, %s2949_s19  }
  0x69   : > { %p3158_p11 = por %p3349_p4, %p46_p0  ;;  %p3162_p10 = por %p250_p8, %p52_p5 }
  0x6a   : > { %s2027_s29 = sshll.u32 %s394_s25, 4  ;;  %s2208_s15 = sshll.u32 %s2953_s20, 8 }
  0x6b   : > { %s3372_s28 = scalar_select %p3158_p11, 1, 0 }
  0x6c   : > { %s3373_s12 = scalar_select %p3162_p10, 1, 0 }
  0x6d   : > { %s3170_s14 = scalar_lea.hbm %s3333_s0, %s2208_s15  ;;  %s398_s27 = scalar_lea.vmem [#allocation2], %s2027_s29 }
  0x6e   : > { %s406_s1 = sshll.u32 %s398_s27, 4  ;;  %p3174_p12 = pnand %p2329_p9, %p3143_p1  ;;  %s407_s1 = int_to_ptr.vmem [resolvable:$true] %s406_s1 }
  0x6f   : > { %s395_s4 = scalar_lea.sflag [#allocation3], %s394_s25  ;;  %s2797_s5 = scalar_lea.hbm %s3170_s14, 256 }
  0x70   : > { %p2798_p13 = scmp.ne.s32.totalorder %s3170_s14, %s2797_s5  ;;  %p2799_p7 = pneg %p3174_p12 }
  0x71   : > { %s2802_s13 = scalar_lea.hbm %s3333_s0, 1536  ;;  %p2803_p5 = scmp.lt.s32.totalorder %s3170_s14, %s3333_s0 }
  0x72   : > { %p2800_p0 = pnand %p2799_p7, %p2798_p13  ;;  %p2804_p1 = scmp.lt.s32.totalorder %s2802_s13, %s2797_s5 }
  0x74   : > { %p2801_p2 = pneg %p2800_p0  ;;  %p2805_p3 = por %p2804_p1, %p2803_p5 }
  0x76   : > { %p2806_p8 = pnand %p2805_p3, %p2801_p2 }
  0x78   : > { %2809 = shalt.err (!%p2806_p8)
}
  0x79   : > { %s2810_s16 = scalar_lea.vmem %s407_s1, 256  ;;  %s2967_s25 = smov [#allocation2]  }
  0x7a   : > { %p2811_p9 = scmp.ne.s32.totalorder %s407_s1, %s2810_s16  ;;  %s2815_s6 = sshll.u32 %s2967_s25, 4  ;;  %s2816_s6 = int_to_ptr.vmem [resolvable:$false] %s2815_s6 }
  0x7b   : > { %s2817_s8 = scalar_lea.vmem %s2816_s6, 512  ;;  %p2818_p13 = scmp.lt.s32.totalorder %s407_s1, %s2816_s6 }
  0x7c   : > { %p2813_p4 = pnand %p2811_p9, %p2799_p7  ;;  %p2819_p0 = scmp.lt.s32.totalorder %s2817_s8, %s2810_s16 }
  0x7e   : > { %p2814_p10 = pneg %p2813_p4  ;;  %p2820_p11 = por %p2819_p0, %p2818_p13 }
  0x80   : > { %p2821_p6 = pnand %p2820_p11, %p2814_p10 }
  0x82   : > { %2824 = shalt.err (!%p2821_p6)
}
  0x83   : > { %2318 = dma.hbm_to_vmem [thread:$0]  (!%p3174_p12), %s3170_s14, 256, %s407_s1, %s395_s4  }
  0x84   : > { %p3375_p2 = scmp.ne.s32.totalorder %s3358_s24, 0 }
  0x85   : > { %s3195_s5 = sand.u32 (!%p3375_p2), 1, %s2945_s18   ;;  %p3376_p4 = scmp.ne.s32.totalorder (!%p3375_p2), %s3371_s22, 0 }
  0x86   : > { %415 = sbr.rel (%p3375_p2) target bundleno = 1122 (0x462), region = 56  ;;  %s2031_s15 = sshll.u32 (!%p3375_p2), %s3195_s5, 4 }
  0x87   : > { %s418_s26 = scalar_lea.sflag (!%p3375_p2), [#allocation3], %s3195_s5  ;;  %s3199_s6 = scalar_lea.vmem (!%p3375_p2), [#allocation2], %s2031_s15 }
  0x8b   : > { %2916 = dma.done.wait (%p3376_p4), %s418_s26, 256  }
  0x8c   : > { %2918 = vsyncadd (%p3376_p4), %s418_s26, 4294967040  ;;  %p3377_p6 = scmp.eq.s32.totalorder %s3056_s23, 0 }
  0x8e   : > { %2920 = dma.done.wait (%p3377_p6), [#allocation6], 18432   ;;  %p3378_p11 = pmov %p3377_p6 }
  0x8f   : > { %p3379_p10 = pmov %p3377_p6 }
  0x90   : > { %2922 = vsyncadd (%p3378_p11), [#allocation6], 4294948864 }
  0x91   : > { %2924 = dma.done.wait (%p3379_p10), [#allocation9], 384   ;;  %p3380_p12 = pmov %p3377_p6 }
  0x92   : > { %p3381_p7 = pmov %p3377_p6 }
  0x93   : > { %2926 = vsyncadd (%p3380_p12), [#allocation9], 4294966912 }
  0x94   : > { %2928 = dma.done.wait (%p3381_p7), [#allocation12], 272   ;;  %p3382_p5 = pmov %p3377_p6 }
  0x95   : > { %s2038_s1 = sshll.u32 %s3195_s5, 3  ;;  %p3383_p1 = scmp.ne.s32.totalorder %s3056_s23, 0 }
  0x96   : > { %2930 = vsyncadd (%p3382_p5), [#allocation12], 4294967024  ;;  %s3218_s3 = scalar_lea.vmem [#allocation14], %s2038_s1 }
  0x97   : > { %488 = sbr.rel (%p3383_p1) target bundleno = 159 (0x9f), region = 88 }
  0x9c   : > { %v489_v0 = vld [vmem:[#allocation10] sm:$0xff]  ;;  %v490_v1 = vld [vmem:[#allocation10 + $0x8] sm:$0xff]  ;;  %v493_v2 = vld [vmem:[#allocation11] sm:$0xff] }
  0x9d   : > { %491 = vst [vmem:[#allocation15] sm:$0xff] %v489_v0  ;;  %492 = vst [vmem:[#allocation15 + $0x8] sm:$0xff] %v490_v1  ;;  %v494_v3 = vld [vmem:[#allocation11 + $0x8] sm:$0xff] }
  0x9e   : > { %495 = vst [vmem:[#allocation17] sm:$0xff] %v493_v2  ;;  %496 = vst [vmem:[#allocation17 + $0x8] sm:$0xff] %v494_v3 }
  0x9f PF: > { %v2391_v4 = vld [vmem:[#allocation5 + $0x78] sm:$0xff]   ;;  %v2393_v6 = vld [vmem:[#allocation5 + $0x70] sm:$0xff]   ;;  %v2395_v8 = vld [vmem:[#allocation5 + $0x68] sm:$0xff]   ;;  %vm2969_vm0 = vmmov 0   ;;  %s2970_s14 = smov [#allocation15]   ;;  %p3384_p8 = scmp.eq.s32.totalorder %s3056_s23, 5 }
  0xa0   : > { %v2392_v5 = vld [vmem:[#allocation5 + $0x38] sm:$0xff]   ;;  %2209 = vmatprep.subr.bf16.mxu0 %v2391_v4  ;;  %v2394_v7 = vld [vmem:[#allocation5 + $0x30] sm:$0xff]   ;;  %v2396_v9 = vld [vmem:[#allocation5 + $0x28] sm:$0xff]   ;;  %s1854_s13 = sshll.u32 %s2970_s14, 4  ;;  %s1855_s13 = int_to_ptr.vmem [resolvable:$true] %s1854_s13 }
  0xa1   : > { %2210 = vmatpush3.bf16.msra.mxu0 %v2392_v5  ;;  %v2397_v10 = vld [vmem:[#allocation5 + $0x60] sm:$0xff]   ;;  %v2399_v12 = vld [vmem:[#allocation5 + $0x58] sm:$0xff]   ;;  %v2401_v14 = vld [vmem:[#allocation5 + $0x50] sm:$0xff]   ;;  %s2825_s29 = scalar_lea.vmem %s1855_s13, 256  ;;  %p2832_p0 = scmp.lt.s32.totalorder %s1855_s13, %s1855_s13 }
  0xa2   : > { %2211 = vmatprep.subr.bf16.mxu0 %v2393_v6  ;;  %v2398_v11 = vld [vmem:[#allocation5 + $0x20] sm:$0xff]   ;;  %v2400_v13 = vld [vmem:[#allocation5 + $0x18] sm:$0xff]   ;;  %v2402_v18 = vld [vmem:[#allocation5 + $0x10] sm:$0xff]   ;;  %p2826_p3 = scmp.ne.s32.totalorder %s1855_s13, %s2825_s29  ;;  %p2833_p2 = scmp.lt.s32.totalorder %s2825_s29, %s2825_s29 }
  0xa3   : > { %v498_v15 = vld [vmem:[%s3199_s6 + $0x8] sm:$0xff]  ;;  %v2407_v17 = vld [vmem:[#allocation7 + $0xe4] ss:$16 sps:$4 sm:$0xff]   ;;  %v2412_v20 = vld [vmem:[#allocation7 + $0xe0] ss:$16 sps:$4 sm:$0xff]  }
  0xa4   : > { %v500_v16 = vpack.c.bf16 %v498_v15, %v498_v15  ;;  %v2403_v19 = vld [vmem:[#allocation5 + $0x48] sm:$0xff]   ;;  %1086 = vmatprep.subr.bf16.mxu1 %v2407_v17  ;;  %v2413_v21 = vld [vmem:[#allocation7 + $0xc4] ss:$16 sps:$4 sm:$0xff]   ;;  %v2418_v22 = vld [vmem:[#allocation7 + $0xc0] ss:$16 sps:$4 sm:$0xff]   ;;  %p2827_p9 = pnand %p2826_p3, %p3384_p8  ;;  %p2834_p4 = por %p2833_p2, %p2832_p0 }
  0xa5   : > { %2212 = vmatpush3.bf16.msra.mxu0 %v2394_v7  ;;  %1087 = vmatpush1.bf16.msra.mxu1 %v2412_v20  ;;  %v2419_v23 = vld [vmem:[#allocation7 + $0xa4] ss:$16 sps:$4 sm:$0xff]   ;;  %v2404_v24 = vld [vmem:[#allocation5 + $0x8] sm:$0xff]   ;;  %v2424_v26 = vld [vmem:[#allocation7 + $0xa0] ss:$16 sps:$4 sm:$0xff]  }
  0xa6   : > { %2213 = vmatprep.subr.bf16.mxu0 %v2395_v8  ;;  %668 = vmatprep.mubr.bf16.mxu0 %v500_v16  ;;  %v2405_v25 = vld [vmem:[#allocation5 + $0x40] sm:$0xff]   ;;  %v2411_v30 = vld [vmem:[#allocation7 + $0xec] ss:$16 sps:$4 sm:$0xff]   ;;  %v2409_v34 = vld [vmem:[#allocation7 + $0xe8] ss:$16 sps:$4 sm:$0xff]   ;;  %p2828_p13 = pneg %p2827_p9 }
  0xa7   : > { %1088 = vmatprep.subr.bf16.mxu1 %v2413_v21  ;;  %v2406_v27 = vld [vmem:[#allocation5] sm:$0xff]   ;;  %v2417_v35 = vld [vmem:[#allocation7 + $0xcc] ss:$16 sps:$4 sm:$0xff]   ;;  %v2415_v38 = vld [vmem:[#allocation7 + $0xc8] ss:$16 sps:$4 sm:$0xff]  }
  0xa8   : > { %v2425_v28 = vld [vmem:[#allocation7 + $0x84] ss:$16 sps:$4 sm:$0xff]   ;;  %v2430_v31 = vld [vmem:[#allocation7 + $0x80] ss:$16 sps:$4 sm:$0xff]   ;;  %v2423_v39 = vld [vmem:[#allocation7 + $0xac] ss:$16 sps:$4 sm:$0xff]   ;;  %p2835_p6 = pnand %p2834_p4, %p2828_p13 }
  0xa9   : > { %2214 = vmatpush3.bf16.msra.mxu0 %v2396_v9  ;;  %1089 = vmatpush1.bf16.msra.mxu1 %v2418_v22  ;;  %v497_v29 = vld [vmem:[%s3199_s6] sm:$0xff]  ;;  %v2421_v42 = vld [vmem:[#allocation7 + $0xa8] ss:$16 sps:$4 sm:$0xff]   ;;  %v2429_v43 = vld [vmem:[#allocation7 + $0x8c] ss:$16 sps:$4 sm:$0xff]  }
  0xaa   : > { %2215 = vmatprep.subr.bf16.mxu0 %v2397_v10  ;;  %1090 = vmatprep.subr.bf16.mxu1 %v2419_v23  ;;  %v499_v32 = vpack.c.bf16 %v497_v29, %v497_v29  ;;  %v2431_v33 = vld [vmem:[#allocation7 + $0x64] ss:$16 sps:$4 sm:$0xff]   ;;  %v2436_v36 = vld [vmem:[#allocation7 + $0x60] ss:$16 sps:$4 sm:$0xff]   ;;  %v2427_v46 = vld [vmem:[#allocation7 + $0x88] ss:$16 sps:$4 sm:$0xff]  }
  0xab   : > { %v2437_v37 = vld [vmem:[#allocation7 + $0x44] ss:$16 sps:$4 sm:$0xff]   ;;  %v2442_v40 = vld [vmem:[#allocation7 + $0x40] ss:$16 sps:$4 sm:$0xff]   ;;  %v2435_v47 = vld [vmem:[#allocation7 + $0x6c] ss:$16 sps:$4 sm:$0xff]  }
  0xac   : > { %v2443_v41 = vld [vmem:[#allocation7 + $0x24] ss:$16 sps:$4 sm:$0xff]   ;;  %v2448_v44 = vld [vmem:[#allocation7 + $0x20] ss:$16 sps:$4 sm:$0xff]   ;;  %v2433_v50 = vld [vmem:[#allocation7 + $0x68] ss:$16 sps:$4 sm:$0xff]  }
  0xad   : > { %2216 = vmatpush3.bf16.msra.mxu0 %v2398_v11  ;;  %1091 = vmatpush1.bf16.msra.mxu1 %v2424_v26  ;;  %v2449_v45 = vld [vmem:[#allocation7 + $0x4] ss:$16 sps:$4 sm:$0xff]   ;;  %v2454_v48 = vld [vmem:[#allocation7] ss:$16 sps:$4 sm:$0xff]   ;;  %v2441_v51 = vld [vmem:[#allocation7 + $0x4c] ss:$16 sps:$4 sm:$0xff]  }
  0xae   : > { %2217 = vmatprep.subr.bf16.mxu0 %v2399_v12  ;;  %1092 = vmatprep.subr.bf16.mxu1 %v2425_v28  ;;  %v2455_v49 = vld [vmem:[#allocation7 + $0x1e4] ss:$16 sps:$4 sm:$0xff]   ;;  %v2460_v52 = vld [vmem:[#allocation7 + $0x1e0] ss:$16 sps:$4 sm:$0xff]   ;;  %v2439_v54 = vld [vmem:[#allocation7 + $0x48] ss:$16 sps:$4 sm:$0xff]  }
  0xaf   : > { %v2461_v53 = vld [vmem:[#allocation7 + $0x1c4] ss:$16 sps:$4 sm:$0xff]   ;;  %v2447_v55 = vld [vmem:[#allocation7 + $0x2c] ss:$16 sps:$4 sm:$0xff]   ;;  %v2445_v56 = vld [vmem:[#allocation7 + $0x28] ss:$16 sps:$4 sm:$0xff]  }
  0xb0   : > { %v2466_v57 = vld [vmem:[#allocation7 + $0x1c0] ss:$16 sps:$4 sm:$0xff]   ;;  %v2467_v58 = vld [vmem:[#allocation7 + $0x1a4] ss:$16 sps:$4 sm:$0xff]   ;;  %v2453_v59 = vld [vmem:[#allocation7 + $0xc] ss:$16 sps:$4 sm:$0xff]  }
  0xb1   : > { %2218 = vmatpush3.bf16.msra.mxu0 %v2400_v13  ;;  %1093 = vmatpush1.bf16.msra.mxu1 %v2430_v31  ;;  %v2472_v60 = vld [vmem:[#allocation7 + $0x1a0] ss:$16 sps:$4 sm:$0xff]   ;;  %v2473_v61 = vld [vmem:[#allocation7 + $0x184] ss:$16 sps:$4 sm:$0xff]   ;;  %v2451_v62 = vld [vmem:[#allocation7 + $0x8] ss:$16 sps:$4 sm:$0xff]  }
  0xb2   : > { %2219 = vmatprep.subr.bf16.mxu0 %v2401_v14  ;;  %1094 = vmatprep.subr.bf16.mxu1 %v2431_v33  ;;  %v2459_v63 = vld [vmem:[#allocation7 + $0x1ec] ss:$16 sps:$4 sm:$0xff]   ;;  %v2478_v0 = vld [vmem:[#allocation7 + $0x180] ss:$16 sps:$4 sm:$0xff]   ;;  %v2479_v1 = vld [vmem:[#allocation7 + $0x164] ss:$16 sps:$4 sm:$0xff]  }
  0xb3   : > { %v2457_v2 = vld [vmem:[#allocation7 + $0x1e8] ss:$16 sps:$4 sm:$0xff]   ;;  %v2465_v3 = vld [vmem:[#allocation7 + $0x1cc] ss:$16 sps:$4 sm:$0xff]   ;;  %v2484_v4 = vld [vmem:[#allocation7 + $0x160] ss:$16 sps:$4 sm:$0xff]  }
  0xb4   : > { %v2485_v5 = vld [vmem:[#allocation7 + $0x144] ss:$16 sps:$4 sm:$0xff]   ;;  %v2463_v6 = vld [vmem:[#allocation7 + $0x1c8] ss:$16 sps:$4 sm:$0xff]   ;;  %v2471_v7 = vld [vmem:[#allocation7 + $0x1ac] ss:$16 sps:$4 sm:$0xff]  }
  0xb5   : > { %2220 = vmatpush3.bf16.msra.mxu0 %v2402_v18  ;;  %1095 = vmatpush1.bf16.msra.mxu1 %v2436_v36  ;;  %v2490_v8 = vld [vmem:[#allocation7 + $0x140] ss:$16 sps:$4 sm:$0xff]   ;;  %v2469_v9 = vld [vmem:[#allocation7 + $0x1a8] ss:$16 sps:$4 sm:$0xff]   ;;  %v2477_v10 = vld [vmem:[#allocation7 + $0x18c] ss:$16 sps:$4 sm:$0xff]  }
  0xb6   : > { %2221 = vmatprep.subr.bf16.mxu0 %v2403_v19  ;;  %1096 = vmatprep.subr.bf16.mxu1 %v2437_v37  ;;  %v2475_v11 = vld [vmem:[#allocation7 + $0x188] ss:$16 sps:$4 sm:$0xff]   ;;  %v2483_v12 = vld [vmem:[#allocation7 + $0x16c] ss:$16 sps:$4 sm:$0xff]   ;;  %v2491_v16 = vld [vmem:[#allocation7 + $0x124] ss:$16 sps:$4 sm:$0xff]  }
  0xb7   : > { %v2481_v13 = vld [vmem:[#allocation7 + $0x168] ss:$16 sps:$4 sm:$0xff]   ;;  %v2489_v14 = vld [vmem:[#allocation7 + $0x14c] ss:$16 sps:$4 sm:$0xff]   ;;  %v2496_v19 = vld [vmem:[#allocation7 + $0x120] ss:$16 sps:$4 sm:$0xff]  }
  0xb8   : > { %v2487_v15 = vld [vmem:[#allocation7 + $0x148] ss:$16 sps:$4 sm:$0xff]   ;;  %v2495_v17 = vld [vmem:[#allocation7 + $0x12c] ss:$16 sps:$4 sm:$0xff]   ;;  %v2497_v20 = vld [vmem:[#allocation7 + $0x104] ss:$16 sps:$4 sm:$0xff]  }
  0xb9   : > { %2222 = vmatpush3.bf16.msra.mxu0 %v2404_v24  ;;  %1097 = vmatpush1.bf16.msra.mxu1 %v2442_v40  ;;  %v2493_v18 = vld [vmem:[#allocation7 + $0x128] ss:$16 sps:$4 sm:$0xff]   ;;  %v2501_v21 = vld [vmem:[#allocation7 + $0x10c] ss:$16 sps:$4 sm:$0xff]   ;;  %v2502_v23 = vld [vmem:[#allocation7 + $0x100] ss:$16 sps:$4 sm:$0xff]  }
  0xba   : > { %2223 = vmatprep.subr.bf16.mxu0 %v2405_v25  ;;  %1098 = vmatprep.subr.bf16.mxu1 %v2443_v41  ;;  %v2499_v22 = vld [vmem:[#allocation7 + $0x108] ss:$16 sps:$4 sm:$0xff]   ;;  %v2505_v26 = vld [vmem:[#allocation7 + $0x2e4] ss:$16 sps:$4 sm:$0xff]   ;;  %v2040_v29 = vld [vmem:[%s3335_s2] ss:$0 sm:$0xff] }
  0xbb   : > { %v676_v24 = vld [vmem:[#allocation15] sm:$0xff] }
  0xbc   : > { %v679_v25 = vpack.c.bf16 %v676_v24, %v676_v24  ;;  %v2506_v36 = vld [vmem:[#allocation7 + $0x2e8] ss:$16 sps:$4 sm:$0xff]   ;;  %v2509_v40 = vld [vmem:[#allocation7 + $0x2c0] ss:$16 sps:$4 sm:$0xff]  }
  0xbd   : > { %2224 = vmatpush3.bf16.msra.mxu0 %v2406_v27  ;;  %1099 = vmatpush1.bf16.msra.mxu1 %v2448_v44  ;;  %v2508_v27 = vld [vmem:[#allocation7 + $0x2ec] ss:$16 sps:$4 sm:$0xff]   ;;  %v2512_v41 = vld [vmem:[#allocation7 + $0x2c8] ss:$16 sps:$4 sm:$0xff]   ;;  %v2515_v44 = vld [vmem:[#allocation7 + $0x2a0] ss:$16 sps:$4 sm:$0xff]  }
  0xbe   : > { %1127 = vmatprep.subr.bf16.mxu0 %v2411_v30  ;;  %1100 = vmatprep.subr.bf16.mxu1 %v2449_v45  ;;  %v2518_v45 = vld [vmem:[#allocation7 + $0x2a8] ss:$16 sps:$4 sm:$0xff]   ;;  %v2581_v24 = vld [vmem:[#allocation7 + $0x340] ss:$16 sps:$4 sm:$0xff]  }
  0xbf   : > { %1118 = vmatprep.mubr.bf16.mxu1 %v679_v25 }
  0xc0   : > { %669 = vmatmul.mubr.bf16.vlgmr.msra.gmra.mxu0 %v499_v32 }
  0xc1   : > { %1128 = vmatpush1.bf16.msra.mxu0 %v2409_v34  ;;  %1101 = vmatpush1.bf16.msra.mxu1 %v2454_v48  ;;  %v2521_v48 = vld [vmem:[#allocation7 + $0x280] ss:$16 sps:$4 sm:$0xff]  }
  0xc2   : > { %1129 = vmatprep.subr.bf16.mxu0 %v2417_v35  ;;  %1102 = vmatprep.subr.bf16.mxu1 %v2455_v49  ;;  %v2503_v35 = vld [vmem:[#allocation7 + $0x2e0] ss:$16 sps:$4 sm:$0xff]   ;;  %v2524_v49 = vld [vmem:[#allocation7 + $0x288] ss:$16 sps:$4 sm:$0xff]  }
  0xc3   : > { %1159 = vmatprep.mubr.bf16.mxu0 %v679_v25  ;;  %v2584_v25 = vld [vmem:[#allocation7 + $0x348] ss:$16 sps:$4 sm:$0xff]  }
  0xc5   : > { %1130 = vmatpush1.bf16.msra.mxu0 %v2415_v38  ;;  %1103 = vmatpush2.bf16.msra.mxu1 %v2460_v52  ;;  %v2511_v38 = vld [vmem:[#allocation7 + $0x2c4] ss:$16 sps:$4 sm:$0xff]   ;;  %v2527_v52 = vld [vmem:[#allocation7 + $0x260] ss:$16 sps:$4 sm:$0xff]  }
  0xc6   : > { %1131 = vmatprep.subr.bf16.mxu0 %v2423_v39  ;;  %1104 = vmatprep.subr.bf16.mxu1 %v2461_v53  ;;  %v2514_v39 = vld [vmem:[#allocation7 + $0x2cc] ss:$16 sps:$4 sm:$0xff]   ;;  %v2530_v53 = vld [vmem:[#allocation7 + $0x268] ss:$16 sps:$4 sm:$0xff]  }
  0xc9   : > { %1132 = vmatpush1.bf16.msra.mxu0 %v2421_v42  ;;  %1105 = vmatpush2.bf16.msra.mxu1 %v2466_v57  ;;  %v2517_v42 = vld [vmem:[#allocation7 + $0x2a4] ss:$16 sps:$4 sm:$0xff]   ;;  %v2536_v57 = vld [vmem:[#allocation7 + $0x248] ss:$16 sps:$4 sm:$0xff]  }
  0xca   : > { %1133 = vmatprep.subr.bf16.mxu0 %v2429_v43  ;;  %1106 = vmatprep.subr.bf16.mxu1 %v2467_v58  ;;  %v2520_v43 = vld [vmem:[#allocation7 + $0x2ac] ss:$16 sps:$4 sm:$0xff]   ;;  %v2541_v58 = vld [vmem:[#allocation7 + $0x224] ss:$16 sps:$4 sm:$0xff]  }
  0xcd   : > { %1134 = vmatpush1.bf16.msra.mxu0 %v2427_v46  ;;  %1107 = vmatpush2.bf16.msra.mxu1 %v2472_v60  ;;  %v2523_v46 = vld [vmem:[#allocation7 + $0x284] ss:$16 sps:$4 sm:$0xff]   ;;  %v2539_v60 = vld [vmem:[#allocation7 + $0x220] ss:$16 sps:$4 sm:$0xff]  }
  0xce   : > { %1135 = vmatprep.subr.bf16.mxu0 %v2435_v47  ;;  %1108 = vmatprep.subr.bf16.mxu1 %v2473_v61  ;;  %v2526_v47 = vld [vmem:[#allocation7 + $0x28c] ss:$16 sps:$4 sm:$0xff]   ;;  %v2542_v61 = vld [vmem:[#allocation7 + $0x228] ss:$16 sps:$4 sm:$0xff]  }
  0xd1   : > { %1136 = vmatpush1.bf16.msra.mxu0 %v2433_v50  ;;  %1109 = vmatpush2.bf16.msra.mxu1 %v2478_v0  ;;  %v2529_v50 = vld [vmem:[#allocation7 + $0x264] ss:$16 sps:$4 sm:$0xff]   ;;  %v2545_v0 = vld [vmem:[#allocation7 + $0x200] ss:$16 sps:$4 sm:$0xff]  }
  0xd2   : > { %1137 = vmatprep.subr.bf16.mxu0 %v2441_v51  ;;  %1110 = vmatprep.subr.bf16.mxu1 %v2479_v1  ;;  %v2532_v51 = vld [vmem:[#allocation7 + $0x26c] ss:$16 sps:$4 sm:$0xff]   ;;  %v2548_v1 = vld [vmem:[#allocation7 + $0x208] ss:$16 sps:$4 sm:$0xff]  }
  0xd5   : > { %1138 = vmatpush1.bf16.msra.mxu0 %v2439_v54  ;;  %1111 = vmatpush2.bf16.msra.mxu1 %v2484_v4  ;;  %v2535_v54 = vld [vmem:[#allocation7 + $0x244] ss:$16 sps:$4 sm:$0xff]   ;;  %v2551_v4 = vld [vmem:[#allocation7 + $0x3e0] ss:$16 sps:$4 sm:$0xff]  }
  0xd6   : > { %1139 = vmatprep.subr.bf16.mxu0 %v2447_v55  ;;  %1112 = vmatprep.subr.bf16.mxu1 %v2485_v5  ;;  %v2538_v55 = vld [vmem:[#allocation7 + $0x24c] ss:$16 sps:$4 sm:$0xff]   ;;  %v2554_v5 = vld [vmem:[#allocation7 + $0x3e8] ss:$16 sps:$4 sm:$0xff]  }
  0xd9   : > { %1140 = vmatpush1.bf16.msra.mxu0 %v2445_v56  ;;  %1113 = vmatpush2.bf16.msra.mxu1 %v2490_v8  ;;  %v2533_v56 = vld [vmem:[#allocation7 + $0x240] ss:$16 sps:$4 sm:$0xff]  }
  0xda   : > { %1141 = vmatprep.subr.bf16.mxu0 %v2453_v59  ;;  %1114 = vmatprep.subr.bf16.mxu1 %v2491_v16  ;;  %v2544_v59 = vld [vmem:[#allocation7 + $0x22c] ss:$16 sps:$4 sm:$0xff]   ;;  %v2557_v8 = vld [vmem:[#allocation7 + $0x3c0] ss:$16 sps:$4 sm:$0xff]  }
  0xdb   : > { %v2569_v16 = vld [vmem:[#allocation7 + $0x380] ss:$16 sps:$4 sm:$0xff]  }
  0xdd   : > { %1142 = vmatpush1.bf16.msra.mxu0 %v2451_v62  ;;  %1115 = vmatpush2.bf16.msra.mxu1 %v2496_v19  ;;  %v2547_v62 = vld [vmem:[#allocation7 + $0x204] ss:$16 sps:$4 sm:$0xff]  }
  0xde   : > { %1143 = vmatprep.subr.bf16.mxu0 %v2459_v63  ;;  %1116 = vmatprep.subr.bf16.mxu1 %v2497_v20  ;;  %v2550_v63 = vld [vmem:[#allocation7 + $0x20c] ss:$16 sps:$4 sm:$0xff]   ;;  %v2577_v19 = vld [vmem:[#allocation7 + $0x364] ss:$16 sps:$4 sm:$0xff]   ;;  %v2578_v20 = vld [vmem:[#allocation7 + $0x368] ss:$16 sps:$4 sm:$0xff]  }
  0xe1   : > { %1144 = vmatpush2.bf16.msra.mxu0 %v2457_v2  ;;  %1117 = vmatpush2.bf16.msra.mxu1 %v2502_v23  ;;  %v2553_v2 = vld [vmem:[#allocation7 + $0x3e4] ss:$16 sps:$4 sm:$0xff]   ;;  %v2586_v23 = vld [vmem:[#allocation7 + $0x34c] ss:$16 sps:$4 sm:$0xff]  }
  0xe2   : > { %1145 = vmatprep.subr.bf16.mxu0 %v2465_v3  ;;  %1608 = vmatprep.subr.bf16.mxu1 %v2505_v26  ;;  %v2556_v3 = vld [vmem:[#allocation7 + $0x3ec] ss:$16 sps:$4 sm:$0xff]   ;;  %v2589_v26 = vld [vmem:[#allocation7 + $0x324] ss:$16 sps:$4 sm:$0xff]  }
  0xe5   : > { %1146 = vmatpush2.bf16.msra.mxu0 %v2463_v6  ;;  %v2559_v6 = vld [vmem:[#allocation7 + $0x3c4] ss:$16 sps:$4 sm:$0xff]  }
  0xe6   : > { %1147 = vmatprep.subr.bf16.mxu0 %v2471_v7  ;;  %v2562_v7 = vld [vmem:[#allocation7 + $0x3cc] ss:$16 sps:$4 sm:$0xff]  }
  0xe9   : > { %1148 = vmatpush2.bf16.msra.mxu0 %v2469_v9  ;;  %v2560_v9 = vld [vmem:[#allocation7 + $0x3c8] ss:$16 sps:$4 sm:$0xff]  }
  0xea   : > { %1149 = vmatprep.subr.bf16.mxu0 %v2477_v10  ;;  %v2565_v10 = vld [vmem:[#allocation7 + $0x3a4] ss:$16 sps:$4 sm:$0xff]  }
  0xed   : > { %1150 = vmatpush2.bf16.msra.mxu0 %v2475_v11  ;;  %v2568_v11 = vld [vmem:[#allocation7 + $0x3ac] ss:$16 sps:$4 sm:$0xff]  }
  0xee   : > { %1151 = vmatprep.subr.bf16.mxu0 %v2483_v12  ;;  %v2563_v12 = vld [vmem:[#allocation7 + $0x3a0] ss:$16 sps:$4 sm:$0xff]  }
  0xf1   : > { %1152 = vmatpush2.bf16.msra.mxu0 %v2481_v13  ;;  %v2566_v13 = vld [vmem:[#allocation7 + $0x3a8] ss:$16 sps:$4 sm:$0xff]  }
  0xf2   : > { %1153 = vmatprep.subr.bf16.mxu0 %v2489_v14  ;;  %v2571_v14 = vld [vmem:[#allocation7 + $0x384] ss:$16 sps:$4 sm:$0xff]  }
  0xf5   : > { %1154 = vmatpush2.bf16.msra.mxu0 %v2487_v15  ;;  %v2574_v15 = vld [vmem:[#allocation7 + $0x38c] ss:$16 sps:$4 sm:$0xff]  }
  0xf6   : > { %1155 = vmatprep.subr.bf16.mxu0 %v2495_v17  ;;  %v2572_v17 = vld [vmem:[#allocation7 + $0x388] ss:$16 sps:$4 sm:$0xff]  }
  0xf9   : > { %1156 = vmatpush2.bf16.msra.mxu0 %v2493_v18  ;;  %v2575_v18 = vld [vmem:[#allocation7 + $0x360] ss:$16 sps:$4 sm:$0xff]  }
  0xfa   : > { %1157 = vmatprep.subr.bf16.mxu0 %v2501_v21  ;;  %v2580_v21 = vld [vmem:[#allocation7 + $0x36c] ss:$16 sps:$4 sm:$0xff]  }
  0xfd   : > { %1158 = vmatpush2.bf16.msra.mxu0 %v2499_v22  ;;  %v2583_v22 = vld [vmem:[#allocation7 + $0x344] ss:$16 sps:$4 sm:$0xff]  }
  0xfe   : > { %1649 = vmatprep.subr.bf16.mxu0 %v2508_v27  ;;  %v2592_v27 = vld [vmem:[#allocation7 + $0x32c] ss:$16 sps:$4 sm:$0xff]  }
 0x180   : > { %v2225_v28 = vpop.f32.mrf.mxu0 }
 0x182   : > { %v2226_v30 = vpop.f32.mrf.mxu0 }
 0x183   : > { %v2227_v31 = vadd.f32 %v2226_v30, %v2225_v28  ;;  %v1195_v28 = vld [vmem:[#allocation15 + $0x8] sm:$0xff] }
 0x184   : > { %v2228_v32 = vpop.f32.mrf.mxu0  ;;  %v2587_v30 = vld [vmem:[#allocation7 + $0x320] ss:$16 sps:$4 sm:$0xff]  }
 0x185   : > { %v671_v33 = vadd.f32 %v2227_v31, %v2040_v29  ;;  %v1199_v29 = vpack.c.bf16 %v1195_v28, %v1195_v28  ;;  %v2590_v31 = vld [vmem:[#allocation7 + $0x328] ss:$16 sps:$4 sm:$0xff]   ;;  %v2595_v32 = vld [vmem:[#allocation7 + $0x304] ss:$16 sps:$4 sm:$0xff]  }
 0x186   : > { %v2229_v34 = vpop.f32.mrf.mxu0 }
 0x187   : > { %v678_v37 = vpack.c.bf16 %v671_v33, %v671_v33  ;;  %v2598_v33 = vld [vmem:[#allocation7 + $0x30c] ss:$16 sps:$4 sm:$0xff]   ;;  %v2593_v34 = vld [vmem:[#allocation7 + $0x300] ss:$16 sps:$4 sm:$0xff]  }
 0x189   : > { %1119 = vmatmul.mubr.bf16.vlgmr.msra.gmra.mxu1 %v678_v37  ;;  %1160 = vmatmul.mubr.bf16.vlgmr.msra.gmra.mxu0 %v678_v37 }
 0x18a   : > { %1609 = vmatpush1.bf16.msra.mxu1 %v2503_v35  ;;  %1650 = vmatpush1.bf16.msra.mxu0 %v2506_v36  ;;  %v2596_v35 = vld [vmem:[#allocation7 + $0x308] ss:$16 sps:$4 sm:$0xff]   ;;  %v746_v36 = vlaneseq }
 0x18b   : > { %1610 = vmatprep.subr.bf16.mxu1 %v2511_v38  ;;  %1651 = vmatprep.subr.bf16.mxu0 %v2514_v39  ;;  %v744_v39 = vld [vmem:[#allocation8] sm:$0xf] }
 0x18c   : > { %1640 = vmatprep.mubr.bf16.mxu1 %v1199_v29  ;;  %1681 = vmatprep.mubr.bf16.mxu0 %v1199_v29  ;;  %v3227_v37 = vshrl.u32 %v746_v36, 7 }
 0x18e   : > { %1611 = vmatpush1.bf16.msra.mxu1 %v2509_v40  ;;  %1652 = vmatpush1.bf16.msra.mxu0 %v2512_v41  ;;  %v748_v38 = vsub.s32 0, %v3227_v37  ;;  %v752_v40 = vsub.s32 1, %v3227_v37 }
 0x18f   : > { %1612 = vmatprep.subr.bf16.mxu1 %v2517_v42  ;;  %1653 = vmatprep.subr.bf16.mxu0 %v2520_v43 }
 0x190   : > { %v749_v41 = vrot.slane %v744_v39, %v748_v38  ;;  %v753_v42 = vrot.slane %v744_v39, %v752_v40 }
 0x192   : > { %1613 = vmatpush1.bf16.msra.mxu1 %v2515_v44  ;;  %1654 = vmatpush1.bf16.msra.mxu0 %v2518_v45 }
 0x193   : > { %1614 = vmatprep.subr.bf16.mxu1 %v2523_v46  ;;  %1655 = vmatprep.subr.bf16.mxu0 %v2526_v47 }
 0x196   : > { %1615 = vmatpush1.bf16.msra.mxu1 %v2521_v48  ;;  %1656 = vmatpush1.bf16.msra.mxu0 %v2524_v49 }
 0x197   : > { %1616 = vmatprep.subr.bf16.mxu1 %v2529_v50  ;;  %1657 = vmatprep.subr.bf16.mxu0 %v2532_v51  ;;  %v760_v50 = vsub.s32 3, %v3227_v37 }
 0x19a   : > { %1617 = vmatpush1.bf16.msra.mxu1 %v2527_v52  ;;  %1658 = vmatpush1.bf16.msra.mxu0 %v2530_v53 }
 0x19b   : > { %1618 = vmatprep.subr.bf16.mxu1 %v2535_v54  ;;  %1659 = vmatprep.subr.bf16.mxu0 %v2538_v55 }
 0x19e   : > { %1619 = vmatpush1.bf16.msra.mxu1 %v2533_v56  ;;  %1660 = vmatpush1.bf16.msra.mxu0 %v2536_v57  ;;  %v761_v56 = vrot.slane %v744_v39, %v760_v50  ;;  %v756_v57 = vsub.s32 2, %v3227_v37 }
 0x19f   : > { %1620 = vmatprep.subr.bf16.mxu1 %v2541_v58  ;;  %1661 = vmatprep.subr.bf16.mxu0 %v2544_v59 }
 0x1a0   : > { %v757_v59 = vrot.slane %v744_v39, %v756_v57 }
 0x1a2   : > { %1621 = vmatpush1.bf16.msra.mxu1 %v2539_v60  ;;  %1662 = vmatpush1.bf16.msra.mxu0 %v2542_v61 }
 0x1a3   : > { %1622 = vmatprep.subr.bf16.mxu1 %v2547_v62  ;;  %1663 = vmatprep.subr.bf16.mxu0 %v2550_v63 }
 0x1a6   : > { %1623 = vmatpush1.bf16.msra.mxu1 %v2545_v0  ;;  %1664 = vmatpush1.bf16.msra.mxu0 %v2548_v1 }
 0x1a7   : > { %1624 = vmatprep.subr.bf16.mxu1 %v2553_v2  ;;  %1665 = vmatprep.subr.bf16.mxu0 %v2556_v3 }
 0x1aa   : > { %1625 = vmatpush2.bf16.msra.mxu1 %v2551_v4  ;;  %1666 = vmatpush2.bf16.msra.mxu0 %v2554_v5  ;;  %v677_v4 = vld [vmem:[#allocation17] sm:$0xff] }
 0x1ab   : > { %1626 = vmatprep.subr.bf16.mxu1 %v2559_v6  ;;  %1667 = vmatprep.subr.bf16.mxu0 %v2562_v7 }
 0x1ae   : > { %1627 = vmatpush2.bf16.msra.mxu1 %v2557_v8  ;;  %1668 = vmatpush2.bf16.msra.mxu0 %v2560_v9 }
 0x1af   : > { %1628 = vmatprep.subr.bf16.mxu1 %v2565_v10  ;;  %1669 = vmatprep.subr.bf16.mxu0 %v2568_v11 }
 0x1b2   : > { %1629 = vmatpush2.bf16.msra.mxu1 %v2563_v12  ;;  %1670 = vmatpush2.bf16.msra.mxu0 %v2566_v13 }
 0x1b3   : > { %1630 = vmatprep.subr.bf16.mxu1 %v2571_v14  ;;  %1671 = vmatprep.subr.bf16.mxu0 %v2574_v15  ;;  %v2599_v15 = vld [vmem:[%s3340_s7 + $0x38] sm:$0xff]  }
 0x1b6   : > { %1631 = vmatpush2.bf16.msra.mxu1 %v2569_v16  ;;  %1672 = vmatpush2.bf16.msra.mxu0 %v2572_v17  ;;  %v2968_v16 = vmov 0.0   ;;  %v2600_v17 = vld [vmem:[%s3340_s7 + $0x30] sm:$0xff]  }
 0x1b7   : > { %1632 = vmatprep.subr.bf16.mxu1 %v2577_v19  ;;  %1673 = vmatprep.subr.bf16.mxu0 %v2580_v21  ;;  %v2602_v19 = vld [vmem:[%s3340_s7 + $0x20] sm:$0xff]   ;;  %v2604_v21 = vld [vmem:[%s3340_s7 + $0x10] sm:$0xff]  }
 0x1ba   : > { %1633 = vmatpush2.bf16.msra.mxu1 %v2575_v18  ;;  %1674 = vmatpush2.bf16.msra.mxu0 %v2578_v20  ;;  %v2601_v18 = vld [vmem:[%s3340_s7 + $0x28] sm:$0xff]   ;;  %v2603_v20 = vld [vmem:[%s3340_s7 + $0x18] sm:$0xff]  }
 0x1bb   : > { %1634 = vmatprep.subr.bf16.mxu1 %v2583_v22  ;;  %1675 = vmatprep.subr.bf16.mxu0 %v2586_v23  ;;  %v2605_v22 = vld [vmem:[%s3340_s7 + $0x8] sm:$0xff]   ;;  %v2606_v23 = vld [vmem:[%s3340_s7] sm:$0xff]  }
 0x1be   : > { %1635 = vmatpush2.bf16.msra.mxu1 %v2581_v24  ;;  %1676 = vmatpush2.bf16.msra.mxu0 %v2584_v25  ;;  %v1266_v24 = vld [vmem:[#allocation8 + $0x4] sm:$0xf] }
 0x1bf   : > { %1636 = vmatprep.subr.bf16.mxu1 %v2589_v26  ;;  %1677 = vmatprep.subr.bf16.mxu0 %v2592_v27  ;;  %v1271_v25 = vrot.slane %v1266_v24, %v748_v38  ;;  %v1275_v26 = vrot.slane %v1266_v24, %v752_v40  ;;  %v1283_v38 = vrot.slane %v1266_v24, %v760_v50 }
 0x1c0   : > { %v1279_v40 = vrot.slane %v1266_v24, %v756_v57 }
 0x1c2   : > { %1637 = vmatpush2.bf16.msra.mxu1 %v2587_v30  ;;  %1678 = vmatpush2.bf16.msra.mxu0 %v2590_v31 }
 0x1c3   : > { %1638 = vmatprep.subr.bf16.mxu1 %v2595_v32  ;;  %1679 = vmatprep.subr.bf16.mxu0 %v2598_v33 }
 0x1c6   : > { %1639 = vmatpush2.bf16.msra.mxu1 %v2593_v34  ;;  %1680 = vmatpush2.bf16.msra.mxu0 %v2596_v35 }
 0x1c7   : > { %2240 = vmatprep.subr.bf16.mxu1 %v2968_v16 }
 0x249   : > { %v1120_v43 = vpop.f32.mrf.mxu1  ;;  %v1161_v44 = vpop.f32.mrf.mxu0 }
 0x24a   : > { %v1121_v45 = vadd.f32 %v1120_v43, %v749_v41  ;;  %v1162_v62 = vadd.f32 %v1161_v44, %v757_v59 }
 0x24b   : > { %v1122_v46 = vpop.f32.mrf.mxu1  ;;  %v1163_v47 = vpop.f32.mrf.mxu0 }
 0x24c   : > { %v2121_v48 = vmul.f32 -1.442695, %v1121_v45  ;;  %v1123_v49 = vadd.f32 %v1122_v46, %v753_v42  ;;  %v1164_v58 = vadd.f32 %v1163_v47, %v761_v56 }
 0x24d   : > { %v1124_v51 = vpop.f32.mrf.mxu1  ;;  %v1165_v52 = vpop.f32.mrf.mxu0 }
 0x24e   : > { %2607 = vpow2.f32 %v2121_v48  ;;  %v2122_v53 = vmul.f32 -1.442695, %v1123_v49  ;;  %v2123_v60 = vmul.f32 -1.442695, %v1164_v58  ;;  %v1197_v52 = vld [vmem:[#allocation17 + $0x8] sm:$0xff] }
 0x24f   : > { %v1125_v54 = vpop.f32.mrf.mxu1  ;;  %v1166_v55 = vpop.f32.mrf.mxu0 }
 0x250   : > { %2609 = vpow2.f32 %v2122_v53 }
 0x251   : > { %2611 = vpow2.f32 %v2123_v60 }
 0x25b   : > { %v2608_v61 = vpop.eup %2607 }
 0x25c   : > { %v1171_v63 = vadd.f32 1.0, %v2608_v61 }
 0x25d   : > { %v2610_v0 = vpop.eup %2609 }
 0x25e   : > { %2613 = vrcp.f32 %v1171_v63  ;;  %v1177_v1 = vadd.f32 1.0, %v2610_v0  ;;  %v2612_v2 = vpop.eup %2611 }
 0x25f   : > { %2615 = vtanh.f32 %v1162_v62  ;;  %v1184_v7 = vadd.f32 1.0, %v2612_v2 }
 0x260   : > { %2617 = vrcp.f32 %v1177_v1 }
 0x261   : > { %2619 = vrcp.f32 %v1184_v7 }
 0x26b   : > { %v2614_v3 = vpop.eup %2613 }
 0x26c   : > { %v2616_v5 = vpop.eup %2615 }
 0x26d   : > { %v2618_v6 = vpop.eup %2617  ;;  %v1188_v8 = vmul.f32 %v2616_v5, %v2614_v3 }
 0x26e   : > { %v1187_v9 = vmul.f32 %v2618_v6, %v677_v4  ;;  %v2620_v11 = vpop.eup %2619 }
 0x270   : > { %v1189_v10 = vadd.f32 %v1188_v8, %v1187_v9 }
 0x272   : > { %1193 = vst [vmem:[#allocation17] sm:$0xff] %v1189_v10  ;;  %2621 = vtanh.f32 %v1189_v10 }
 0x27f   : > { %v2622_v12 = vpop.eup %2621 }
 0x280   : > { %v1191_v13 = vmul.f32 %v2622_v12, %v2620_v11 }
 0x282   : > { %v1198_v14 = vpack.c.bf16 %v1191_v13, %v1191_v13  ;;  %1192 = vst [vmem:[#allocation15] sm:$0xff] %v1191_v13 }
 0x284   : > { %1641 = vmatmul.mubr.bf16.vlgmr.msra.gmra.mxu1 %v1198_v14  ;;  %1682 = vmatmul.mubr.bf16.vlgmr.msra.gmra.mxu0 %v1198_v14 }
 0x285   : > { %2241 = vmatpush3.bf16.msra.mxu1 %v2599_v15  ;;  %2256 = vmatprep.mubr.msk.bf16.mxu1 %vm2969_vm0, %v2968_v16 }
 0x286   : > { %2242 = vmatprep.subr.bf16.mxu1 %v2968_v16 }
 0x289   : > { %2243 = vmatpush3.bf16.msra.mxu1 %v2600_v17 }
 0x28a   : > { %2244 = vmatprep.subr.bf16.mxu1 %v2968_v16 }
 0x28d   : > { %2245 = vmatpush3.bf16.msra.mxu1 %v2601_v18 }
 0x28e   : > { %2246 = vmatprep.subr.bf16.mxu1 %v2968_v16 }
 0x291   : > { %2247 = vmatpush3.bf16.msra.mxu1 %v2602_v19 }
 0x292   : > { %2248 = vmatprep.subr.bf16.mxu1 %v2968_v16 }
 0x295   : > { %2249 = vmatpush3.bf16.msra.mxu1 %v2603_v20 }
 0x296   : > { %2250 = vmatprep.subr.bf16.mxu1 %v2968_v16 }
 0x299   : > { %2251 = vmatpush3.bf16.msra.mxu1 %v2604_v21 }
 0x29a   : > { %2252 = vmatprep.subr.bf16.mxu1 %v2968_v16 }
 0x29d   : > { %2253 = vmatpush3.bf16.msra.mxu1 %v2605_v22 }
 0x29e   : > { %2254 = vmatprep.subr.bf16.mxu1 %v2968_v16 }
 0x2a1   : > { %2255 = vmatpush3.bf16.msra.mxu1 %v2606_v23 }
 0x344   : > { %v1642_v27 = vpop.f32.mrf.mxu1  ;;  %v1683_v28 = vpop.f32.mrf.mxu0 }
 0x345   : > { %v1643_v29 = vadd.f32 %v1642_v27, %v1271_v25  ;;  %v1684_v45 = vadd.f32 %v1683_v28, %v1279_v40 }
 0x346   : > { %v1644_v30 = vpop.f32.mrf.mxu1  ;;  %v1685_v31 = vpop.f32.mrf.mxu0 }
 0x347   : > { %v2188_v32 = vmul.f32 -1.442695, %v1643_v29  ;;  %v1645_v33 = vadd.f32 %v1644_v30, %v1275_v26  ;;  %v1686_v42 = vadd.f32 %v1685_v31, %v1283_v38 }
 0x348   : > { %v1646_v34 = vpop.f32.mrf.mxu1  ;;  %v1687_v35 = vpop.f32.mrf.mxu0 }
 0x349   : > { %2623 = vpow2.f32 %v2188_v32  ;;  %v2189_v36 = vmul.f32 -1.442695, %v1645_v33  ;;  %v2190_v43 = vmul.f32 -1.442695, %v1686_v42 }
 0x34a   : > { %v1647_v39 = vpop.f32.mrf.mxu1  ;;  %v1688_v41 = vpop.f32.mrf.mxu0 }
 0x34b   : > { %2625 = vpow2.f32 %v2189_v36 }
 0x34c   : > { %2627 = vpow2.f32 %v2190_v43 }
 0x356   : > { %v2624_v44 = vpop.eup %2623 }
 0x357   : > { %v1693_v46 = vadd.f32 1.0, %v2624_v44 }
 0x358   : > { %v2626_v47 = vpop.eup %2625 }
 0x359   : > { %2629 = vrcp.f32 %v1693_v46  ;;  %v1699_v48 = vadd.f32 1.0, %v2626_v47  ;;  %v2628_v49 = vpop.eup %2627 }
 0x35a   : > { %2631 = vtanh.f32 %v1684_v45  ;;  %v1706_v50 = vadd.f32 1.0, %v2628_v49 }
 0x35b   : > { %2633 = vrcp.f32 %v1699_v48 }
 0x35c   : > { %2635 = vrcp.f32 %v1706_v50 }
 0x366   : > { %v2630_v51 = vpop.eup %2629 }
 0x367   : > { %v2632_v53 = vpop.eup %2631 }
 0x368   : > { %v2634_v54 = vpop.eup %2633  ;;  %v1710_v55 = vmul.f32 %v2632_v53, %v2630_v51 }
 0x369   : > { %v1709_v56 = vmul.f32 %v2634_v54, %v1197_v52  ;;  %v2636_v57 = vpop.eup %2635 }
 0x36b   : > { %v1711_v37 = vadd.f32 %v1710_v55, %v1709_v56 }
 0x36d   : > { %1715 = vst [vmem:[#allocation17 + $0x8] sm:$0xff] %v1711_v37  ;;  %2637 = vtanh.f32 %v1711_v37 }
 0x37a   : > { %v2638_v58 = vpop.eup %2637 }
 0x37b   : > { %v1713_v59 = vmul.f32 %v2638_v58, %v2636_v57 }
 0x37d   : > { %v1716_v60 = vpack.c.bf16 %v1713_v59, %v1713_v59  ;;  %1714 = vst [vmem:[#allocation15 + $0x8] sm:$0xff] %v1713_v59 }
 0x37f   : > { %2257 = vmatmul.mubr.bf16.vlgmr.msra.gmra.mxu1 %v1716_v60 }
 0x380   : > { %2838 = shalt.err (!%p2835_p6)
}
 0x381   : > { %s2971_s27 = smov 128   ;;  %s2972_s16 = smov 8  }
 0x382   : > { %p3385_p11 = pmov %p3384_p8  ;;  %s2973_s26 = smov [#allocation17]  }
 0x383   : > { %s1867_s6 = sshll.u32 %s2973_s26, 4  ;;  %p3386_p12 = pmov %p3384_p8  ;;  %s1868_s6 = int_to_ptr.vmem [resolvable:$true] %s1867_s6 }
 0x384   : > { %2288 = dma.vmem_to_hbm [thread:$0]  (%p3385_p11), %s1855_s13, 256, %s3343_s10, [#allocation16], %s2971_s27, %s2971_s27, %s2972_s16  }
 0x385   : > { %s2849_s1 = scalar_lea.vmem %s1868_s6, 256  ;;  %p2856_p1 = scmp.lt.s32.totalorder %s1868_s6, %s1868_s6 }
 0x386   : > { %p2850_p10 = scmp.ne.s32.totalorder %s1868_s6, %s2849_s1  ;;  %p2857_p3 = scmp.lt.s32.totalorder %s2849_s1, %s2849_s1 }
 0x388   : > { %p2851_p7 = pnand %p2850_p10, %p3386_p12  ;;  %p2858_p8 = por %p2857_p3, %p2856_p1 }
 0x38a   : > { %p2852_p5 = pneg %p2851_p7 }
 0x38c   : > { %p2859_p9 = pnand %p2858_p8, %p2852_p5 }
 0x38e   : > { %2862 = shalt.err (!%p2859_p9)
}
 0x38f   : > { %p3387_p13 = pmov %p3385_p11  ;;  %v2191_v61 = vld [vmem:[#allocation13] ss:$0 sm:$0xff]  ;;  %s2201_s24 = sshll.u32 %s3056_s23, 7 }
 0x390   : > { %s1844_s22 = sshll.u32 %s3218_s3, 4  ;;  %s3292_s29 = scalar_lea.hbm %s3342_s9, %s2201_s24  ;;  %s1845_s22 = int_to_ptr.vmem [resolvable:$true] %s1844_s22 }
 0x391   : > { %2290 = dma.vmem_to_hbm [thread:$0]  (%p3387_p13), %s1868_s6, 256, %s3344_s11, [#allocation16], %s2971_s27, %s2971_s27, %s2972_s16  }
 0x392   : > { %s1831_s25 = scalar_lea.sflag [#allocation4], %s3195_s5  ;;  %s2873_s27 = scalar_lea.vmem %s1845_s22, 128 }
 0x393   : > { %p2874_p0 = scmp.ne.s32.totalorder %s1845_s22, %s2873_s27  ;;  %p3388_p2 = scmp.ne.s32.totalorder %s3372_s28, 0 }
 0x394   : > { %s2974_s16 = smov [#allocation14]  }
 0x395   : > { %p2875_p4 = pnand %p2874_p0, %p3388_p2  ;;  %s2877_s15 = sshll.u32 %s2974_s16, 4  ;;  %s2878_s15 = int_to_ptr.vmem [resolvable:$false] %s2877_s15 }
 0x396   : > { %s2879_s26 = scalar_lea.vmem %s2878_s15, 256  ;;  %p2880_p11 = scmp.lt.s32.totalorder %s1845_s22, %s2878_s15 }
 0x397   : > { %p2876_p6 = pneg %p2875_p4  ;;  %p2881_p10 = scmp.lt.s32.totalorder %s2879_s26, %s2873_s27 }
 0x399   : > { %p2882_p12 = por %p2881_p10, %p2880_p11 }
 0x39b   : > { %p2883_p7 = pnand %p2882_p12, %p2876_p6 }
 0x43f   : > { %v1822_v62 = vpop.f32.mrf.mxu1 }
 0x440   : > { %v1823_v63 = vadd.f32 %v2191_v61, %v1822_v62 }
 0x441   : > { %v2258_v0 = vpop.f32.mrf.mxu1 }
 0x442   : > { %2639 = vtanh.f32 %v1823_v63 }
 0x443   : > { %v1825_v1 = vpop.f32.mrf.mxu1 }
 0x445   : > { %v2259_v2 = vpop.f32.mrf.mxu1 }
 0x44f   : > { %v2640_v3 = vpop.eup %2639 }
 0x450   : > { %1829 = vst [vmem:[%s3218_s3] sm:$0xff] %v2640_v3 }
 0x451   : > { %2886 = shalt.err (!%p2883_p7)
}
 0x452   : > { %s2887_s3 = scalar_lea.hbm %s3292_s29, 128  ;;  %s2891_s1 = scalar_lea.hbm %s3342_s9, 768 }
 0x453   : > { %p2888_p5 = scmp.ne.s32.totalorder %s3292_s29, %s2887_s3  ;;  %p2892_p8 = scmp.lt.s32.totalorder %s3292_s29, %s3342_s9 }
 0x454   : > { %p2893_p9 = scmp.lt.s32.totalorder %s2891_s1, %s2887_s3 }
 0x455   : > { %p2889_p1 = pnand %p2888_p5, %p3388_p2 }
 0x456   : > { %p2894_p13 = por %p2893_p9, %p2892_p8 }
 0x457   : > { %p2890_p3 = pneg %p2889_p1 }
 0x459   : > { %p2895_p0 = pnand %p2894_p13, %p2890_p3 }
 0x45b   : > { %2898 = shalt.err (!%p2895_p0)
}
 0x45c   : > { %2286 = dma.vmem_to_hbm [thread:$0]  (%p3388_p2), %s1845_s22, 128, %s3292_s29, %s1831_s25  }
 0x45d   : > { %p3389_p4 = scmp.eq.s32.totalorder %s3056_s23, 5 }
 0x45f   : > { %2932 = dma.done.wait (%p3389_p4), [#allocation16], 512   ;;  %p3390_p6 = pmov %p3389_p4 }
 0x461   : > { %2934 = vsyncadd (%p3390_p6), [#allocation16], 4294966784 }
 0x462 PF: > { %p2340_p11 = scmp.ge.s32.totalorder %s2953_s20, 2  ;;  %s1890_s24 = sand.u32 1, %s2941_s17  }
 0x463   : > { %p3391_p10 = scmp.ne.s32.totalorder %s3373_s12, 0  ;;  %s1891_s14 = scalar_lea.sflag [#allocation4], %s1890_s24 }
 0x465   : > { %p2320_p12 = pnand %p2340_p11, %p3391_p10 }
 0x467   : > { %p2321_p7 = pneg %p2320_p12 }
 0x469   : > { %2936 = dma.done.wait (%p2321_p7), %s1891_s14, 128  }
 0x46a   : > { %2938 = vsyncadd (%p2321_p7), %s1891_s14, 4294967168  ;;  %p29_p2 = scmp.ge.s32.totalorder %s3130_s30, 8   ;;  %s3392_s17 = smov %s2945_s18 }
 0x46b   : > { %s3393_s18 = smov %s2949_s19  ;;  %s3394_s19 = smov %s3141_s21 }
 0x46c   : > { %s3395_s20 = smov %s3130_s30  ;;  %31 = sbr.rel (!%p29_p2) target bundleno = 16 (0x10), region = 149 }
 0x471   :  { %1896 = vsyncpa [#allocation3], 1 }
 0x472   :  { %1898 = vsyncpa [#allocation3 + $0x1], 1 }
 0x473   :  { %1899 = vsyncpa [#allocation6], 1 }
 0x474   :  { %1900 = vsyncpa [#allocation9], 1 }
 0x475   :  { %1901 = vsyncpa [#allocation12], 1 }
 0x476   :  { %1902 = vsyncpa [#allocation4], 1 }
 0x477   :  { %1904 = vsyncpa [#allocation4 + $0x1], 1 }
 0x478   :  { %1905 = vsyncpa [#allocation16], 1 }

</bundles_post_ra>
